<compile_context>
chip_gen: v6e
topology: v6e:2x2x1
jax: 0.10.0
libtpu: 0.0.40
codegen_flags: <defaults>
</compile_context>

<pallas_src>
import functools

import jax
import jax.numpy as jnp
from jax.experimental import pallas as pl
from jax.experimental.pallas import tpu as pltpu
import numpy as np

IN_FEATURES = 10
OUT_FEATURES = 10
HIDDEN = 32
FC_HIDDEN = 32


def _lstm_bi_fc_kernel(
    x_ref,        # (S*B, IN)
    wih_ref,      # (IN, 8H)  [fwd 4H | bwd 4H], each block in (i,f,o,g) column order
    b_ref,        # (1, 8H)   fused bih+bhh, same layout
    whh_f_ref,    # (H, 4H)   forward recurrent weights (i,f,o,g)
    whh_b_ref,    # (H, 4H)   backward recurrent weights (i,f,o,g)
    wof_ref,      # (H, OUT)  combined fc∘fc2 weights applied to forward hidden
    wob_ref,      # (H, OUT)  combined fc∘fc2 weights applied to backward hidden
    bo_ref,       # (1, OUT)  combined fc∘fc2 bias
    out_ref,      # (S*B, OUT)
    *, seq_len, batch, hidden,
):
    S, B, H = seq_len, batch, hidden

    # One MXU pass computes the input projections (+ bias) for both directions, all timesteps.
    xp = jnp.dot(x_ref[...], wih_ref[...], preferred_element_type=jnp.float32) + b_ref[...]
    xp_f = xp[:, : 4 * H]       # lane-aligned slices (4H == 128)
    xp_b = xp[:, 4 * H:]

    whh_f = whh_f_ref[...]
    whh_b = whh_b_ref[...]

    def cell(pre, h, c, whh):
        # Gate layout (reordered in the wrapper): [i | f | o | g]
        gates = pre + jnp.dot(h, whh, preferred_element_type=jnp.float32)
        sig = jax.nn.sigmoid(gates[:, : 3 * H])     # i, f, o in one EUP slab
        g = jnp.tanh(gates[:, 3 * H:])
        i = sig[:, :H]
        f = sig[:, H:2 * H]
        o = sig[:, 2 * H:]
        c_new = f * c + i * g
        h_new = o * jnp.tanh(c_new)
        return h_new, c_new

    zeros = jnp.zeros((B, H), jnp.float32)
    hf, cf = zeros, zeros
    hb, cb = zeros, zeros
    fwd_hs = [None] * S
    bwd_hs = [None] * S

    # Fully unrolled, interleaved recurrences (two independent dependency chains overlap).
    for t in range(S):
        tb = S - 1 - t
        hf, cf = cell(xp_f[t * B:(t + 1) * B, :], hf, cf, whh_f)
        hb, cb = cell(xp_b[tb * B:(tb + 1) * B, :], hb, cb, whh_b)
        fwd_hs[t] = hf
        bwd_hs[tb] = hb

    Hf = jnp.concatenate(fwd_hs, axis=0)   # (S*B, H)
    Hb = jnp.concatenate(bwd_hs, axis=0)   # (S*B, H)

    # Collapsed fc∘fc2 epilogue: two small matmuls + bias, one dense store.
    y = (jnp.dot(Hf, wof_ref[...], preferred_element_type=jnp.float32)
         + jnp.dot(Hb, wob_ref[...], preferred_element_type=jnp.float32)
         + bo_ref[...])
    out_ref[...] = y


def _reorder_ifog(w):
    # PyTorch gate order (i, f, g, o) along last axis -> (i, f, o, g)
    i, f, g, o = jnp.split(w, 4, axis=-1)
    return jnp.concatenate([i, f, o, g], axis=-1)


def date_info_predict_forward(x, params):
    S, B, IN = x.shape
    (wih_f, whh_f, bih_f, bhh_f,
     wih_b, whh_b, bih_b, bhh_b,
     fc_w, fc_b, fc2_w, fc2_b) = params

    H = whh_f.shape[1]  # whh_f is (4H, H)

    # Parameter prep (plain JAX glue, fuses into the surrounding XLA program):
    #  * transpose + gate-column reorder, fuse the two LSTM biases,
    #  * concatenate fwd/bwd input-projection weights into one (IN, 8H) matrix,
    #  * collapse fc -> fc2 (no nonlinearity in between) into one linear, split per direction.
    wih_cat = jnp.concatenate([_reorder_ifog(wih_f.T), _reorder_ifog(wih_b.T)], axis=1)        # (IN, 8H)
    b_cat = jnp.concatenate([_reorder_ifog(bih_f + bhh_f),
                             _reorder_ifog(bih_b + bhh_b)], axis=0)[None, :]                   # (1, 8H)
    w_comb = fc_w.T @ fc2_w.T                          # (2H, OUT)
    b_comb = (fc_b @ fc2_w.T + fc2_b)[None, :]         # (1, OUT)

    args = (
        x.reshape(S * B, IN),
        wih_cat, b_cat,
        _reorder_ifog(whh_f.T), _reorder_ifog(whh_b.T),
        w_comb[:H], w_comb[H:], b_comb,
    )

    vmem = pl.BlockSpec(memory_space=pltpu.MemorySpace.VMEM)
    out2d = pl.pallas_call(
        functools.partial(_lstm_bi_fc_kernel, seq_len=S, batch=B, hidden=H),
        out_shape=jax.ShapeDtypeStruct((S * B, OUT_FEATURES), jnp.float32),
        in_specs=[vmem] * len(args),
        out_specs=vmem,
    )(*args)
    return out2d.reshape(S, B, OUT_FEATURES)


# ---------------- pure-JAX reference (for correctness check) ----------------
def reference_forward(x, params):
    (wih_f, whh_f, bih_f, bhh_f,
     wih_b, whh_b, bih_b, bhh_b,
     fc_w, fc_b, fc2_w, fc2_b) = params
    S, B, _ = x.shape
    H = whh_f.shape[1]

    def run_dir(wih, whh, bih, bhh, rev):
        h = jnp.zeros((B, H), jnp.float32)
        c = jnp.zeros((B, H), jnp.float32)
        ts = range(S - 1, -1, -1) if rev else range(S)
        outs = [None] * S
        for t in ts:
            g = x[t] @ wih.T + h @ whh.T + bih + bhh
            i = jax.nn.sigmoid(g[:, :H])
            f = jax.nn.sigmoid(g[:, H:2 * H])
            gg = jnp.tanh(g[:, 2 * H:3 * H])
            o = jax.nn.sigmoid(g[:, 3 * H:])
            c = f * c + i * gg
            h = o * jnp.tanh(c)
            outs[t] = h
        return jnp.stack(outs, axis=0)

    out_f = run_dir(wih_f, whh_f, bih_f, bhh_f, False)
    out_b = run_dir(wih_b, whh_b, bih_b, bhh_b, True)
    out = jnp.concatenate([out_f, out_b], axis=-1)
    z = out @ fc_w.T + fc_b
    return z @ fc2_w.T + fc2_b


def make_params(key):
    ks = jax.random.split(key, 12)
    sc = 0.1
    wih_f = sc * jax.random.normal(ks[0], (4 * HIDDEN, IN_FEATURES), jnp.float32)
    whh_f = sc * jax.random.normal(ks[1], (4 * HIDDEN, HIDDEN), jnp.float32)
    bih_f = sc * jax.random.normal(ks[2], (4 * HIDDEN,), jnp.float32)
    bhh_f = sc * jax.random.normal(ks[3], (4 * HIDDEN,), jnp.float32)
    wih_b = sc * jax.random.normal(ks[4], (4 * HIDDEN, IN_FEATURES), jnp.float32)
    whh_b = sc * jax.random.normal(ks[5], (4 * HIDDEN, HIDDEN), jnp.float32)
    bih_b = sc * jax.random.normal(ks[6], (4 * HIDDEN,), jnp.float32)
    bhh_b = sc * jax.random.normal(ks[7], (4 * HIDDEN,), jnp.float32)
    fc_w = sc * jax.random.normal(ks[8], (FC_HIDDEN, 2 * HIDDEN), jnp.float32)
    fc_b = sc * jax.random.normal(ks[9], (FC_HIDDEN,), jnp.float32)
    fc2_w = sc * jax.random.normal(ks[10], (OUT_FEATURES, FC_HIDDEN), jnp.float32)
    fc2_b = sc * jax.random.normal(ks[11], (OUT_FEATURES,), jnp.float32)
    return (wih_f, whh_f, bih_f, bhh_f,
            wih_b, whh_b, bih_b, bhh_b,
            fc_w, fc_b, fc2_w, fc2_b)


if __name__ == "__main__":
    key = jax.random.PRNGKey(0)
    k_x, k_p = jax.random.split(key)
    seq_len, batch = 8, 2
    x = jax.random.normal(k_x, (seq_len, batch, IN_FEATURES), jnp.float32)
    params = make_params(k_p)

    out = jax.block_until_ready(date_info_predict_forward(x, params))
    ref = jax.block_until_ready(reference_forward(x, params))

    assert out.shape == (seq_len, batch, OUT_FEATURES)
    # atol slightly above 1e-5: the fc∘fc2 collapse re-associates two f32 matmuls.
    np.testing.assert_allclose(np.asarray(out), np.asarray(ref), rtol=1e-5, atol=2e-5)
    print("KERNEL_OK")
</pallas_src>

<mosaic_0001>
module attributes {stable_mosaic.version = 11 : i64} {
  func.func @_lstm_bi_fc_kernel(%arg0: memref<16x10xf32, #tpu.memory_space<vmem>>, %arg1: memref<10x256xf32, #tpu.memory_space<vmem>>, %arg2: memref<1x256xf32, #tpu.memory_space<vmem>>, %arg3: memref<32x128xf32, #tpu.memory_space<vmem>>, %arg4: memref<32x128xf32, #tpu.memory_space<vmem>>, %arg5: memref<32x10xf32, #tpu.memory_space<vmem>>, %arg6: memref<32x10xf32, #tpu.memory_space<vmem>>, %arg7: memref<1x10xf32, #tpu.memory_space<vmem>>, %arg8: memref<16x10xf32, #tpu.memory_space<vmem>>) attributes {dimension_semantics = [], scalar_prefetch = 0 : i64, scratch_operands = 0 : i64, tpu.core_type = #tpu.core_type<tc>} {
    %c0 = arith.constant 0 : index
    %c0_0 = arith.constant 0 : index
    %0 = vector.load %arg0[%c0, %c0_0] : memref<16x10xf32, #tpu.memory_space<vmem>>, vector<16x10xf32>
    %c0_1 = arith.constant 0 : index
    %c0_2 = arith.constant 0 : index
    %1 = vector.load %arg1[%c0_1, %c0_2] : memref<10x256xf32, #tpu.memory_space<vmem>>, vector<10x256xf32>
    %cst = arith.constant dense<0.000000e+00> : vector<16x256xf32>
    %2 = tpu.matmul %0, %1, %cst {dimension_numbers = #tpu.dot_dimension_numbers<[1], [0], [0], [1], [0, 0, 1, 1], [], []>} : vector<16x10xf32>, vector<10x256xf32>, vector<16x256xf32> -> vector<16x256xf32>
    %c0_3 = arith.constant 0 : index
    %c0_4 = arith.constant 0 : index
    %3 = vector.load %arg2[%c0_3, %c0_4] : memref<1x256xf32, #tpu.memory_space<vmem>>, vector<1x256xf32>
    %4 = vector.broadcast %3 : vector<1x256xf32> to vector<16x256xf32>
    %5 = arith.addf %2, %4 : vector<16x256xf32>
    %6 = vector.extract_strided_slice %5 {offsets = [0, 0], sizes = [16, 128], strides = [1, 1]} : vector<16x256xf32> to vector<16x128xf32>
    %7 = vector.extract_strided_slice %5 {offsets = [0, 128], sizes = [16, 128], strides = [1, 1]} : vector<16x256xf32> to vector<16x128xf32>
    %c0_5 = arith.constant 0 : index
    %c0_6 = arith.constant 0 : index
    %8 = vector.load %arg3[%c0_5, %c0_6] : memref<32x128xf32, #tpu.memory_space<vmem>>, vector<32x128xf32>
    %c0_7 = arith.constant 0 : index
    %c0_8 = arith.constant 0 : index
    %9 = vector.load %arg4[%c0_7, %c0_8] : memref<32x128xf32, #tpu.memory_space<vmem>>, vector<32x128xf32>
    %cst_9 = arith.constant 0.000000e+00 : f32
    %10 = vector.broadcast %cst_9 : f32 to vector<2x32xf32>
    %11 = vector.extract_strided_slice %6 {offsets = [0, 0], sizes = [2, 128], strides = [1, 1]} : vector<16x128xf32> to vector<2x128xf32>
    %cst_10 = arith.constant dense<0.000000e+00> : vector<2x128xf32>
    %12 = tpu.matmul %10, %8, %cst_10 {dimension_numbers = #tpu.dot_dimension_numbers<[1], [0], [0], [1], [0, 0, 1, 1], [], []>} : vector<2x32xf32>, vector<32x128xf32>, vector<2x128xf32> -> vector<2x128xf32>
    %13 = arith.addf %11, %12 : vector<2x128xf32>
    %14 = vector.extract_strided_slice %13 {offsets = [0, 0], sizes = [2, 96], strides = [1, 1]} : vector<2x128xf32> to vector<2x96xf32>
    %15 = arith.negf %14 : vector<2x96xf32>
    %16 = math.exp %15 : vector<2x96xf32>
    %cst_11 = arith.constant 1.000000e+00 : f32
    %17 = vector.broadcast %cst_11 : f32 to vector<2x96xf32>
    %18 = arith.addf %17, %16 : vector<2x96xf32>
    %19 = arith.divf %17, %18 : vector<2x96xf32>
    %20 = vector.extract_strided_slice %13 {offsets = [0, 96], sizes = [2, 32], strides = [1, 1]} : vector<2x128xf32> to vector<2x32xf32>
    %21 = math.tanh %20 : vector<2x32xf32>
    %22 = vector.extract_strided_slice %19 {offsets = [0, 0], sizes = [2, 32], strides = [1, 1]} : vector<2x96xf32> to vector<2x32xf32>
    %23 = vector.extract_strided_slice %19 {offsets = [0, 32], sizes = [2, 32], strides = [1, 1]} : vector<2x96xf32> to vector<2x32xf32>
    %24 = vector.extract_strided_slice %19 {offsets = [0, 64], sizes = [2, 32], strides = [1, 1]} : vector<2x96xf32> to vector<2x32xf32>
    %25 = arith.mulf %23, %10 : vector<2x32xf32>
    %26 = arith.mulf %22, %21 : vector<2x32xf32>
    %27 = arith.addf %25, %26 : vector<2x32xf32>
    %28 = math.tanh %27 : vector<2x32xf32>
    %29 = arith.mulf %24, %28 : vector<2x32xf32>
    %30 = vector.extract_strided_slice %7 {offsets = [14, 0], sizes = [2, 128], strides = [1, 1]} : vector<16x128xf32> to vector<2x128xf32>
    %cst_12 = arith.constant dense<0.000000e+00> : vector<2x128xf32>
    %31 = tpu.matmul %10, %9, %cst_12 {dimension_numbers = #tpu.dot_dimension_numbers<[1], [0], [0], [1], [0, 0, 1, 1], [], []>} : vector<2x32xf32>, vector<32x128xf32>, vector<2x128xf32> -> vector<2x128xf32>
    %32 = arith.addf %30, %31 : vector<2x128xf32>
    %33 = vector.extract_strided_slice %32 {offsets = [0, 0], sizes = [2, 96], strides = [1, 1]} : vector<2x128xf32> to vector<2x96xf32>
    %34 = arith.negf %33 : vector<2x96xf32>
    %35 = math.exp %34 : vector<2x96xf32>
    %cst_13 = arith.constant 1.000000e+00 : f32
    %36 = vector.broadcast %cst_13 : f32 to vector<2x96xf32>
    %37 = arith.addf %36, %35 : vector<2x96xf32>
    %38 = arith.divf %36, %37 : vector<2x96xf32>
    %39 = vector.extract_strided_slice %32 {offsets = [0, 96], sizes = [2, 32], strides = [1, 1]} : vector<2x128xf32> to vector<2x32xf32>
    %40 = math.tanh %39 : vector<2x32xf32>
    %41 = vector.extract_strided_slice %38 {offsets = [0, 0], sizes = [2, 32], strides = [1, 1]} : vector<2x96xf32> to vector<2x32xf32>
    %42 = vector.extract_strided_slice %38 {offsets = [0, 32], sizes = [2, 32], strides = [1, 1]} : vector<2x96xf32> to vector<2x32xf32>
    %43 = vector.extract_strided_slice %38 {offsets = [0, 64], sizes = [2, 32], strides = [1, 1]} : vector<2x96xf32> to vector<2x32xf32>
    %44 = arith.mulf %42, %10 : vector<2x32xf32>
    %45 = arith.mulf %41, %40 : vector<2x32xf32>
    %46 = arith.addf %44, %45 : vector<2x32xf32>
    %47 = math.tanh %46 : vector<2x32xf32>
    %48 = arith.mulf %43, %47 : vector<2x32xf32>
    %49 = vector.extract_strided_slice %6 {offsets = [2, 0], sizes = [2, 128], strides = [1, 1]} : vector<16x128xf32> to vector<2x128xf32>
    %cst_14 = arith.constant dense<0.000000e+00> : vector<2x128xf32>
    %50 = tpu.matmul %29, %8, %cst_14 {dimension_numbers = #tpu.dot_dimension_numbers<[1], [0], [0], [1], [0, 0, 1, 1], [], []>} : vector<2x32xf32>, vector<32x128xf32>, vector<2x128xf32> -> vector<2x128xf32>
    %51 = arith.addf %49, %50 : vector<2x128xf32>
    %52 = vector.extract_strided_slice %51 {offsets = [0, 0], sizes = [2, 96], strides = [1, 1]} : vector<2x128xf32> to vector<2x96xf32>
    %53 = arith.negf %52 : vector<2x96xf32>
    %54 = math.exp %53 : vector<2x96xf32>
    %cst_15 = arith.constant 1.000000e+00 : f32
    %55 = vector.broadcast %cst_15 : f32 to vector<2x96xf32>
    %56 = arith.addf %55, %54 : vector<2x96xf32>
    %57 = arith.divf %55, %56 : vector<2x96xf32>
    %58 = vector.extract_strided_slice %51 {offsets = [0, 96], sizes = [2, 32], strides = [1, 1]} : vector<2x128xf32> to vector<2x32xf32>
    %59 = math.tanh %58 : vector<2x32xf32>
    %60 = vector.extract_strided_slice %57 {offsets = [0, 0], sizes = [2, 32], strides = [1, 1]} : vector<2x96xf32> to vector<2x32xf32>
    %61 = vector.extract_strided_slice %57 {offsets = [0, 32], sizes = [2, 32], strides = [1, 1]} : vector<2x96xf32> to vector<2x32xf32>
    %62 = vector.extract_strided_slice %57 {offsets = [0, 64], sizes = [2, 32], strides = [1, 1]} : vector<2x96xf32> to vector<2x32xf32>
    %63 = arith.mulf %61, %27 : vector<2x32xf32>
    %64 = arith.mulf %60, %59 : vector<2x32xf32>
    %65 = arith.addf %63, %64 : vector<2x32xf32>
    %66 = math.tanh %65 : vector<2x32xf32>
    %67 = arith.mulf %62, %66 : vector<2x32xf32>
    %68 = vector.extract_strided_slice %7 {offsets = [12, 0], sizes = [2, 128], strides = [1, 1]} : vector<16x128xf32> to vector<2x128xf32>
    %cst_16 = arith.constant dense<0.000000e+00> : vector<2x128xf32>
    %69 = tpu.matmul %48, %9, %cst_16 {dimension_numbers = #tpu.dot_dimension_numbers<[1], [0], [0], [1], [0, 0, 1, 1], [], []>} : vector<2x32xf32>, vector<32x128xf32>, vector<2x128xf32> -> vector<2x128xf32>
    %70 = arith.addf %68, %69 : vector<2x128xf32>
    %71 = vector.extract_strided_slice %70 {offsets = [0, 0], sizes = [2, 96], strides = [1, 1]} : vector<2x128xf32> to vector<2x96xf32>
    %72 = arith.negf %71 : vector<2x96xf32>
    %73 = math.exp %72 : vector<2x96xf32>
    %cst_17 = arith.constant 1.000000e+00 : f32
    %74 = vector.broadcast %cst_17 : f32 to vector<2x96xf32>
    %75 = arith.addf %74, %73 : vector<2x96xf32>
    %76 = arith.divf %74, %75 : vector<2x96xf32>
    %77 = vector.extract_strided_slice %70 {offsets = [0, 96], sizes = [2, 32], strides = [1, 1]} : vector<2x128xf32> to vector<2x32xf32>
    %78 = math.tanh %77 : vector<2x32xf32>
    %79 = vector.extract_strided_slice %76 {offsets = [0, 0], sizes = [2, 32], strides = [1, 1]} : vector<2x96xf32> to vector<2x32xf32>
    %80 = vector.extract_strided_slice %76 {offsets = [0, 32], sizes = [2, 32], strides = [1, 1]} : vector<2x96xf32> to vector<2x32xf32>
    %81 = vector.extract_strided_slice %76 {offsets = [0, 64], sizes = [2, 32], strides = [1, 1]} : vector<2x96xf32> to vector<2x32xf32>
    %82 = arith.mulf %80, %46 : vector<2x32xf32>
    %83 = arith.mulf %79, %78 : vector<2x32xf32>
    %84 = arith.addf %82, %83 : vector<2x32xf32>
    %85 = math.tanh %84 : vector<2x32xf32>
    %86 = arith.mulf %81, %85 : vector<2x32xf32>
    %87 = vector.extract_strided_slice %6 {offsets = [4, 0], sizes = [2, 128], strides = [1, 1]} : vector<16x128xf32> to vector<2x128xf32>
    %cst_18 = arith.constant dense<0.000000e+00> : vector<2x128xf32>
    %88 = tpu.matmul %67, %8, %cst_18 {dimension_numbers = #tpu.dot_dimension_numbers<[1], [0], [0], [1], [0, 0, 1, 1], [], []>} : vector<2x32xf32>, vector<32x128xf32>, vector<2x128xf32> -> vector<2x128xf32>
    %89 = arith.addf %87, %88 : vector<2x128xf32>
    %90 = vector.extract_strided_slice %89 {offsets = [0, 0], sizes = [2, 96], strides = [1, 1]} : vector<2x128xf32> to vector<2x96xf32>
    %91 = arith.negf %90 : vector<2x96xf32>
    %92 = math.exp %91 : vector<2x96xf32>
    %cst_19 = arith.constant 1.000000e+00 : f32
    %93 = vector.broadcast %cst_19 : f32 to vector<2x96xf32>
    %94 = arith.addf %93, %92 : vector<2x96xf32>
    %95 = arith.divf %93, %94 : vector<2x96xf32>
    %96 = vector.extract_strided_slice %89 {offsets = [0, 96], sizes = [2, 32], strides = [1, 1]} : vector<2x128xf32> to vector<2x32xf32>
    %97 = math.tanh %96 : vector<2x32xf32>
    %98 = vector.extract_strided_slice %95 {offsets = [0, 0], sizes = [2, 32], strides = [1, 1]} : vector<2x96xf32> to vector<2x32xf32>
    %99 = vector.extract_strided_slice %95 {offsets = [0, 32], sizes = [2, 32], strides = [1, 1]} : vector<2x96xf32> to vector<2x32xf32>
    %100 = vector.extract_strided_slice %95 {offsets = [0, 64], sizes = [2, 32], strides = [1, 1]} : vector<2x96xf32> to vector<2x32xf32>
    %101 = arith.mulf %99, %65 : vector<2x32xf32>
    %102 = arith.mulf %98, %97 : vector<2x32xf32>
    %103 = arith.addf %101, %102 : vector<2x32xf32>
    %104 = math.tanh %103 : vector<2x32xf32>
    %105 = arith.mulf %100, %104 : vector<2x32xf32>
    %106 = vector.extract_strided_slice %7 {offsets = [10, 0], sizes = [2, 128], strides = [1, 1]} : vector<16x128xf32> to vector<2x128xf32>
    %cst_20 = arith.constant dense<0.000000e+00> : vector<2x128xf32>
    %107 = tpu.matmul %86, %9, %cst_20 {dimension_numbers = #tpu.dot_dimension_numbers<[1], [0], [0], [1], [0, 0, 1, 1], [], []>} : vector<2x32xf32>, vector<32x128xf32>, vector<2x128xf32> -> vector<2x128xf32>
    %108 = arith.addf %106, %107 : vector<2x128xf32>
    %109 = vector.extract_strided_slice %108 {offsets = [0, 0], sizes = [2, 96], strides = [1, 1]} : vector<2x128xf32> to vector<2x96xf32>
    %110 = arith.negf %109 : vector<2x96xf32>
    %111 = math.exp %110 : vector<2x96xf32>
    %cst_21 = arith.constant 1.000000e+00 : f32
    %112 = vector.broadcast %cst_21 : f32 to vector<2x96xf32>
    %113 = arith.addf %112, %111 : vector<2x96xf32>
    %114 = arith.divf %112, %113 : vector<2x96xf32>
    %115 = vector.extract_strided_slice %108 {offsets = [0, 96], sizes = [2, 32], strides = [1, 1]} : vector<2x128xf32> to vector<2x32xf32>
    %116 = math.tanh %115 : vector<2x32xf32>
    %117 = vector.extract_strided_slice %114 {offsets = [0, 0], sizes = [2, 32], strides = [1, 1]} : vector<2x96xf32> to vector<2x32xf32>
    %118 = vector.extract_strided_slice %114 {offsets = [0, 32], sizes = [2, 32], strides = [1, 1]} : vector<2x96xf32> to vector<2x32xf32>
    %119 = vector.extract_strided_slice %114 {offsets = [0, 64], sizes = [2, 32], strides = [1, 1]} : vector<2x96xf32> to vector<2x32xf32>
    %120 = arith.mulf %118, %84 : vector<2x32xf32>
    %121 = arith.mulf %117, %116 : vector<2x32xf32>
    %122 = arith.addf %120, %121 : vector<2x32xf32>
    %123 = math.tanh %122 : vector<2x32xf32>
    %124 = arith.mulf %119, %123 : vector<2x32xf32>
    %125 = vector.extract_strided_slice %6 {offsets = [6, 0], sizes = [2, 128], strides = [1, 1]} : vector<16x128xf32> to vector<2x128xf32>
    %cst_22 = arith.constant dense<0.000000e+00> : vector<2x128xf32>
    %126 = tpu.matmul %105, %8, %cst_22 {dimension_numbers = #tpu.dot_dimension_numbers<[1], [0], [0], [1], [0, 0, 1, 1], [], []>} : vector<2x32xf32>, vector<32x128xf32>, vector<2x128xf32> -> vector<2x128xf32>
    %127 = arith.addf %125, %126 : vector<2x128xf32>
    %128 = vector.extract_strided_slice %127 {offsets = [0, 0], sizes = [2, 96], strides = [1, 1]} : vector<2x128xf32> to vector<2x96xf32>
    %129 = arith.negf %128 : vector<2x96xf32>
    %130 = math.exp %129 : vector<2x96xf32>
    %cst_23 = arith.constant 1.000000e+00 : f32
    %131 = vector.broadcast %cst_23 : f32 to vector<2x96xf32>
    %132 = arith.addf %131, %130 : vector<2x96xf32>
    %133 = arith.divf %131, %132 : vector<2x96xf32>
    %134 = vector.extract_strided_slice %127 {offsets = [0, 96], sizes = [2, 32], strides = [1, 1]} : vector<2x128xf32> to vector<2x32xf32>
    %135 = math.tanh %134 : vector<2x32xf32>
    %136 = vector.extract_strided_slice %133 {offsets = [0, 0], sizes = [2, 32], strides = [1, 1]} : vector<2x96xf32> to vector<2x32xf32>
    %137 = vector.extract_strided_slice %133 {offsets = [0, 32], sizes = [2, 32], strides = [1, 1]} : vector<2x96xf32> to vector<2x32xf32>
    %138 = vector.extract_strided_slice %133 {offsets = [0, 64], sizes = [2, 32], strides = [1, 1]} : vector<2x96xf32> to vector<2x32xf32>
    %139 = arith.mulf %137, %103 : vector<2x32xf32>
    %140 = arith.mulf %136, %135 : vector<2x32xf32>
    %141 = arith.addf %139, %140 : vector<2x32xf32>
    %142 = math.tanh %141 : vector<2x32xf32>
    %143 = arith.mulf %138, %142 : vector<2x32xf32>
    %144 = vector.extract_strided_slice %7 {offsets = [8, 0], sizes = [2, 128], strides = [1, 1]} : vector<16x128xf32> to vector<2x128xf32>
    %cst_24 = arith.constant dense<0.000000e+00> : vector<2x128xf32>
    %145 = tpu.matmul %124, %9, %cst_24 {dimension_numbers = #tpu.dot_dimension_numbers<[1], [0], [0], [1], [0, 0, 1, 1], [], []>} : vector<2x32xf32>, vector<32x128xf32>, vector<2x128xf32> -> vector<2x128xf32>
    %146 = arith.addf %144, %145 : vector<2x128xf32>
    %147 = vector.extract_strided_slice %146 {offsets = [0, 0], sizes = [2, 96], strides = [1, 1]} : vector<2x128xf32> to vector<2x96xf32>
    %148 = arith.negf %147 : vector<2x96xf32>
    %149 = math.exp %148 : vector<2x96xf32>
    %cst_25 = arith.constant 1.000000e+00 : f32
    %150 = vector.broadcast %cst_25 : f32 to vector<2x96xf32>
    %151 = arith.addf %150, %149 : vector<2x96xf32>
    %152 = arith.divf %150, %151 : vector<2x96xf32>
    %153 = vector.extract_strided_slice %146 {offsets = [0, 96], sizes = [2, 32], strides = [1, 1]} : vector<2x128xf32> to vector<2x32xf32>
    %154 = math.tanh %153 : vector<2x32xf32>
    %155 = vector.extract_strided_slice %152 {offsets = [0, 0], sizes = [2, 32], strides = [1, 1]} : vector<2x96xf32> to vector<2x32xf32>
    %156 = vector.extract_strided_slice %152 {offsets = [0, 32], sizes = [2, 32], strides = [1, 1]} : vector<2x96xf32> to vector<2x32xf32>
    %157 = vector.extract_strided_slice %152 {offsets = [0, 64], sizes = [2, 32], strides = [1, 1]} : vector<2x96xf32> to vector<2x32xf32>
    %158 = arith.mulf %156, %122 : vector<2x32xf32>
    %159 = arith.mulf %155, %154 : vector<2x32xf32>
    %160 = arith.addf %158, %159 : vector<2x32xf32>
    %161 = math.tanh %160 : vector<2x32xf32>
    %162 = arith.mulf %157, %161 : vector<2x32xf32>
    %163 = vector.extract_strided_slice %6 {offsets = [8, 0], sizes = [2, 128], strides = [1, 1]} : vector<16x128xf32> to vector<2x128xf32>
    %cst_26 = arith.constant dense<0.000000e+00> : vector<2x128xf32>
    %164 = tpu.matmul %143, %8, %cst_26 {dimension_numbers = #tpu.dot_dimension_numbers<[1], [0], [0], [1], [0, 0, 1, 1], [], []>} : vector<2x32xf32>, vector<32x128xf32>, vector<2x128xf32> -> vector<2x128xf32>
    %165 = arith.addf %163, %164 : vector<2x128xf32>
    %166 = vector.extract_strided_slice %165 {offsets = [0, 0], sizes = [2, 96], strides = [1, 1]} : vector<2x128xf32> to vector<2x96xf32>
    %167 = arith.negf %166 : vector<2x96xf32>
    %168 = math.exp %167 : vector<2x96xf32>
    %cst_27 = arith.constant 1.000000e+00 : f32
    %169 = vector.broadcast %cst_27 : f32 to vector<2x96xf32>
    %170 = arith.addf %169, %168 : vector<2x96xf32>
    %171 = arith.divf %169, %170 : vector<2x96xf32>
    %172 = vector.extract_strided_slice %165 {offsets = [0, 96], sizes = [2, 32], strides = [1, 1]} : vector<2x128xf32> to vector<2x32xf32>
    %173 = math.tanh %172 : vector<2x32xf32>
    %174 = vector.extract_strided_slice %171 {offsets = [0, 0], sizes = [2, 32], strides = [1, 1]} : vector<2x96xf32> to vector<2x32xf32>
    %175 = vector.extract_strided_slice %171 {offsets = [0, 32], sizes = [2, 32], strides = [1, 1]} : vector<2x96xf32> to vector<2x32xf32>
    %176 = vector.extract_strided_slice %171 {offsets = [0, 64], sizes = [2, 32], strides = [1, 1]} : vector<2x96xf32> to vector<2x32xf32>
    %177 = arith.mulf %175, %141 : vector<2x32xf32>
    %178 = arith.mulf %174, %173 : vector<2x32xf32>
    %179 = arith.addf %177, %178 : vector<2x32xf32>
    %180 = math.tanh %179 : vector<2x32xf32>
    %181 = arith.mulf %176, %180 : vector<2x32xf32>
    %182 = vector.extract_strided_slice %7 {offsets = [6, 0], sizes = [2, 128], strides = [1, 1]} : vector<16x128xf32> to vector<2x128xf32>
    %cst_28 = arith.constant dense<0.000000e+00> : vector<2x128xf32>
    %183 = tpu.matmul %162, %9, %cst_28 {dimension_numbers = #tpu.dot_dimension_numbers<[1], [0], [0], [1], [0, 0, 1, 1], [], []>} : vector<2x32xf32>, vector<32x128xf32>, vector<2x128xf32> -> vector<2x128xf32>
    %184 = arith.addf %182, %183 : vector<2x128xf32>
    %185 = vector.extract_strided_slice %184 {offsets = [0, 0], sizes = [2, 96], strides = [1, 1]} : vector<2x128xf32> to vector<2x96xf32>
    %186 = arith.negf %185 : vector<2x96xf32>
    %187 = math.exp %186 : vector<2x96xf32>
    %cst_29 = arith.constant 1.000000e+00 : f32
    %188 = vector.broadcast %cst_29 : f32 to vector<2x96xf32>
    %189 = arith.addf %188, %187 : vector<2x96xf32>
    %190 = arith.divf %188, %189 : vector<2x96xf32>
    %191 = vector.extract_strided_slice %184 {offsets = [0, 96], sizes = [2, 32], strides = [1, 1]} : vector<2x128xf32> to vector<2x32xf32>
    %192 = math.tanh %191 : vector<2x32xf32>
    %193 = vector.extract_strided_slice %190 {offsets = [0, 0], sizes = [2, 32], strides = [1, 1]} : vector<2x96xf32> to vector<2x32xf32>
    %194 = vector.extract_strided_slice %190 {offsets = [0, 32], sizes = [2, 32], strides = [1, 1]} : vector<2x96xf32> to vector<2x32xf32>
    %195 = vector.extract_strided_slice %190 {offsets = [0, 64], sizes = [2, 32], strides = [1, 1]} : vector<2x96xf32> to vector<2x32xf32>
    %196 = arith.mulf %194, %160 : vector<2x32xf32>
    %197 = arith.mulf %193, %192 : vector<2x32xf32>
    %198 = arith.addf %196, %197 : vector<2x32xf32>
    %199 = math.tanh %198 : vector<2x32xf32>
    %200 = arith.mulf %195, %199 : vector<2x32xf32>
    %201 = vector.extract_strided_slice %6 {offsets = [10, 0], sizes = [2, 128], strides = [1, 1]} : vector<16x128xf32> to vector<2x128xf32>
    %cst_30 = arith.constant dense<0.000000e+00> : vector<2x128xf32>
    %202 = tpu.matmul %181, %8, %cst_30 {dimension_numbers = #tpu.dot_dimension_numbers<[1], [0], [0], [1], [0, 0, 1, 1], [], []>} : vector<2x32xf32>, vector<32x128xf32>, vector<2x128xf32> -> vector<2x128xf32>
    %203 = arith.addf %201, %202 : vector<2x128xf32>
    %204 = vector.extract_strided_slice %203 {offsets = [0, 0], sizes = [2, 96], strides = [1, 1]} : vector<2x128xf32> to vector<2x96xf32>
    %205 = arith.negf %204 : vector<2x96xf32>
    %206 = math.exp %205 : vector<2x96xf32>
    %cst_31 = arith.constant 1.000000e+00 : f32
    %207 = vector.broadcast %cst_31 : f32 to vector<2x96xf32>
    %208 = arith.addf %207, %206 : vector<2x96xf32>
    %209 = arith.divf %207, %208 : vector<2x96xf32>
    %210 = vector.extract_strided_slice %203 {offsets = [0, 96], sizes = [2, 32], strides = [1, 1]} : vector<2x128xf32> to vector<2x32xf32>
    %211 = math.tanh %210 : vector<2x32xf32>
    %212 = vector.extract_strided_slice %209 {offsets = [0, 0], sizes = [2, 32], strides = [1, 1]} : vector<2x96xf32> to vector<2x32xf32>
    %213 = vector.extract_strided_slice %209 {offsets = [0, 32], sizes = [2, 32], strides = [1, 1]} : vector<2x96xf32> to vector<2x32xf32>
    %214 = vector.extract_strided_slice %209 {offsets = [0, 64], sizes = [2, 32], strides = [1, 1]} : vector<2x96xf32> to vector<2x32xf32>
    %215 = arith.mulf %213, %179 : vector<2x32xf32>
    %216 = arith.mulf %212, %211 : vector<2x32xf32>
    %217 = arith.addf %215, %216 : vector<2x32xf32>
    %218 = math.tanh %217 : vector<2x32xf32>
    %219 = arith.mulf %214, %218 : vector<2x32xf32>
    %220 = vector.extract_strided_slice %7 {offsets = [4, 0], sizes = [2, 128], strides = [1, 1]} : vector<16x128xf32> to vector<2x128xf32>
    %cst_32 = arith.constant dense<0.000000e+00> : vector<2x128xf32>
    %221 = tpu.matmul %200, %9, %cst_32 {dimension_numbers = #tpu.dot_dimension_numbers<[1], [0], [0], [1], [0, 0, 1, 1], [], []>} : vector<2x32xf32>, vector<32x128xf32>, vector<2x128xf32> -> vector<2x128xf32>
    %222 = arith.addf %220, %221 : vector<2x128xf32>
    %223 = vector.extract_strided_slice %222 {offsets = [0, 0], sizes = [2, 96], strides = [1, 1]} : vector<2x128xf32> to vector<2x96xf32>
    %224 = arith.negf %223 : vector<2x96xf32>
    %225 = math.exp %224 : vector<2x96xf32>
    %cst_33 = arith.constant 1.000000e+00 : f32
    %226 = vector.broadcast %cst_33 : f32 to vector<2x96xf32>
    %227 = arith.addf %226, %225 : vector<2x96xf32>
    %228 = arith.divf %226, %227 : vector<2x96xf32>
    %229 = vector.extract_strided_slice %222 {offsets = [0, 96], sizes = [2, 32], strides = [1, 1]} : vector<2x128xf32> to vector<2x32xf32>
    %230 = math.tanh %229 : vector<2x32xf32>
    %231 = vector.extract_strided_slice %228 {offsets = [0, 0], sizes = [2, 32], strides = [1, 1]} : vector<2x96xf32> to vector<2x32xf32>
    %232 = vector.extract_strided_slice %228 {offsets = [0, 32], sizes = [2, 32], strides = [1, 1]} : vector<2x96xf32> to vector<2x32xf32>
    %233 = vector.extract_strided_slice %228 {offsets = [0, 64], sizes = [2, 32], strides = [1, 1]} : vector<2x96xf32> to vector<2x32xf32>
    %234 = arith.mulf %232, %198 : vector<2x32xf32>
    %235 = arith.mulf %231, %230 : vector<2x32xf32>
    %236 = arith.addf %234, %235 : vector<2x32xf32>
    %237 = math.tanh %236 : vector<2x32xf32>
    %238 = arith.mulf %233, %237 : vector<2x32xf32>
    %239 = vector.extract_strided_slice %6 {offsets = [12, 0], sizes = [2, 128], strides = [1, 1]} : vector<16x128xf32> to vector<2x128xf32>
    %cst_34 = arith.constant dense<0.000000e+00> : vector<2x128xf32>
    %240 = tpu.matmul %219, %8, %cst_34 {dimension_numbers = #tpu.dot_dimension_numbers<[1], [0], [0], [1], [0, 0, 1, 1], [], []>} : vector<2x32xf32>, vector<32x128xf32>, vector<2x128xf32> -> vector<2x128xf32>
    %241 = arith.addf %239, %240 : vector<2x128xf32>
    %242 = vector.extract_strided_slice %241 {offsets = [0, 0], sizes = [2, 96], strides = [1, 1]} : vector<2x128xf32> to vector<2x96xf32>
    %243 = arith.negf %242 : vector<2x96xf32>
    %244 = math.exp %243 : vector<2x96xf32>
    %cst_35 = arith.constant 1.000000e+00 : f32
    %245 = vector.broadcast %cst_35 : f32 to vector<2x96xf32>
    %246 = arith.addf %245, %244 : vector<2x96xf32>
    %247 = arith.divf %245, %246 : vector<2x96xf32>
    %248 = vector.extract_strided_slice %241 {offsets = [0, 96], sizes = [2, 32], strides = [1, 1]} : vector<2x128xf32> to vector<2x32xf32>
    %249 = math.tanh %248 : vector<2x32xf32>
    %250 = vector.extract_strided_slice %247 {offsets = [0, 0], sizes = [2, 32], strides = [1, 1]} : vector<2x96xf32> to vector<2x32xf32>
    %251 = vector.extract_strided_slice %247 {offsets = [0, 32], sizes = [2, 32], strides = [1, 1]} : vector<2x96xf32> to vector<2x32xf32>
    %252 = vector.extract_strided_slice %247 {offsets = [0, 64], sizes = [2, 32], strides = [1, 1]} : vector<2x96xf32> to vector<2x32xf32>
    %253 = arith.mulf %251, %217 : vector<2x32xf32>
    %254 = arith.mulf %250, %249 : vector<2x32xf32>
    %255 = arith.addf %253, %254 : vector<2x32xf32>
    %256 = math.tanh %255 : vector<2x32xf32>
    %257 = arith.mulf %252, %256 : vector<2x32xf32>
    %258 = vector.extract_strided_slice %7 {offsets = [2, 0], sizes = [2, 128], strides = [1, 1]} : vector<16x128xf32> to vector<2x128xf32>
    %cst_36 = arith.constant dense<0.000000e+00> : vector<2x128xf32>
    %259 = tpu.matmul %238, %9, %cst_36 {dimension_numbers = #tpu.dot_dimension_numbers<[1], [0], [0], [1], [0, 0, 1, 1], [], []>} : vector<2x32xf32>, vector<32x128xf32>, vector<2x128xf32> -> vector<2x128xf32>
    %260 = arith.addf %258, %259 : vector<2x128xf32>
    %261 = vector.extract_strided_slice %260 {offsets = [0, 0], sizes = [2, 96], strides = [1, 1]} : vector<2x128xf32> to vector<2x96xf32>
    %262 = arith.negf %261 : vector<2x96xf32>
    %263 = math.exp %262 : vector<2x96xf32>
    %cst_37 = arith.constant 1.000000e+00 : f32
    %264 = vector.broadcast %cst_37 : f32 to vector<2x96xf32>
    %265 = arith.addf %264, %263 : vector<2x96xf32>
    %266 = arith.divf %264, %265 : vector<2x96xf32>
    %267 = vector.extract_strided_slice %260 {offsets = [0, 96], sizes = [2, 32], strides = [1, 1]} : vector<2x128xf32> to vector<2x32xf32>
    %268 = math.tanh %267 : vector<2x32xf32>
    %269 = vector.extract_strided_slice %266 {offsets = [0, 0], sizes = [2, 32], strides = [1, 1]} : vector<2x96xf32> to vector<2x32xf32>
    %270 = vector.extract_strided_slice %266 {offsets = [0, 32], sizes = [2, 32], strides = [1, 1]} : vector<2x96xf32> to vector<2x32xf32>
    %271 = vector.extract_strided_slice %266 {offsets = [0, 64], sizes = [2, 32], strides = [1, 1]} : vector<2x96xf32> to vector<2x32xf32>
    %272 = arith.mulf %270, %236 : vector<2x32xf32>
    %273 = arith.mulf %269, %268 : vector<2x32xf32>
    %274 = arith.addf %272, %273 : vector<2x32xf32>
    %275 = math.tanh %274 : vector<2x32xf32>
    %276 = arith.mulf %271, %275 : vector<2x32xf32>
    %277 = vector.extract_strided_slice %6 {offsets = [14, 0], sizes = [2, 128], strides = [1, 1]} : vector<16x128xf32> to vector<2x128xf32>
    %cst_38 = arith.constant dense<0.000000e+00> : vector<2x128xf32>
    %278 = tpu.matmul %257, %8, %cst_38 {dimension_numbers = #tpu.dot_dimension_numbers<[1], [0], [0], [1], [0, 0, 1, 1], [], []>} : vector<2x32xf32>, vector<32x128xf32>, vector<2x128xf32> -> vector<2x128xf32>
    %279 = arith.addf %277, %278 : vector<2x128xf32>
    %280 = vector.extract_strided_slice %279 {offsets = [0, 0], sizes = [2, 96], strides = [1, 1]} : vector<2x128xf32> to vector<2x96xf32>
    %281 = arith.negf %280 : vector<2x96xf32>
    %282 = math.exp %281 : vector<2x96xf32>
    %cst_39 = arith.constant 1.000000e+00 : f32
    %283 = vector.broadcast %cst_39 : f32 to vector<2x96xf32>
    %284 = arith.addf %283, %282 : vector<2x96xf32>
    %285 = arith.divf %283, %284 : vector<2x96xf32>
    %286 = vector.extract_strided_slice %279 {offsets = [0, 96], sizes = [2, 32], strides = [1, 1]} : vector<2x128xf32> to vector<2x32xf32>
    %287 = math.tanh %286 : vector<2x32xf32>
    %288 = vector.extract_strided_slice %285 {offsets = [0, 0], sizes = [2, 32], strides = [1, 1]} : vector<2x96xf32> to vector<2x32xf32>
    %289 = vector.extract_strided_slice %285 {offsets = [0, 32], sizes = [2, 32], strides = [1, 1]} : vector<2x96xf32> to vector<2x32xf32>
    %290 = vector.extract_strided_slice %285 {offsets = [0, 64], sizes = [2, 32], strides = [1, 1]} : vector<2x96xf32> to vector<2x32xf32>
    %291 = arith.mulf %289, %255 : vector<2x32xf32>
    %292 = arith.mulf %288, %287 : vector<2x32xf32>
    %293 = arith.addf %291, %292 : vector<2x32xf32>
    %294 = math.tanh %293 : vector<2x32xf32>
    %295 = arith.mulf %290, %294 : vector<2x32xf32>
    %296 = vector.extract_strided_slice %7 {offsets = [0, 0], sizes = [2, 128], strides = [1, 1]} : vector<16x128xf32> to vector<2x128xf32>
    %cst_40 = arith.constant dense<0.000000e+00> : vector<2x128xf32>
    %297 = tpu.matmul %276, %9, %cst_40 {dimension_numbers = #tpu.dot_dimension_numbers<[1], [0], [0], [1], [0, 0, 1, 1], [], []>} : vector<2x32xf32>, vector<32x128xf32>, vector<2x128xf32> -> vector<2x128xf32>
    %298 = arith.addf %296, %297 : vector<2x128xf32>
    %299 = vector.extract_strided_slice %298 {offsets = [0, 0], sizes = [2, 96], strides = [1, 1]} : vector<2x128xf32> to vector<2x96xf32>
    %300 = arith.negf %299 : vector<2x96xf32>
    %301 = math.exp %300 : vector<2x96xf32>
    %cst_41 = arith.constant 1.000000e+00 : f32
    %302 = vector.broadcast %cst_41 : f32 to vector<2x96xf32>
    %303 = arith.addf %302, %301 : vector<2x96xf32>
    %304 = arith.divf %302, %303 : vector<2x96xf32>
    %305 = vector.extract_strided_slice %298 {offsets = [0, 96], sizes = [2, 32], strides = [1, 1]} : vector<2x128xf32> to vector<2x32xf32>
    %306 = math.tanh %305 : vector<2x32xf32>
    %307 = vector.extract_strided_slice %304 {offsets = [0, 0], sizes = [2, 32], strides = [1, 1]} : vector<2x96xf32> to vector<2x32xf32>
    %308 = vector.extract_strided_slice %304 {offsets = [0, 32], sizes = [2, 32], strides = [1, 1]} : vector<2x96xf32> to vector<2x32xf32>
    %309 = vector.extract_strided_slice %304 {offsets = [0, 64], sizes = [2, 32], strides = [1, 1]} : vector<2x96xf32> to vector<2x32xf32>
    %310 = arith.mulf %308, %274 : vector<2x32xf32>
    %311 = arith.mulf %307, %306 : vector<2x32xf32>
    %312 = arith.addf %310, %311 : vector<2x32xf32>
    %313 = math.tanh %312 : vector<2x32xf32>
    %314 = arith.mulf %309, %313 : vector<2x32xf32>
    %315 = tpu.concatenate %29, %67, %105, %143, %181, %219, %257, %295 in 0 : vector<2x32xf32>, vector<2x32xf32>, vector<2x32xf32>, vector<2x32xf32>, vector<2x32xf32>, vector<2x32xf32>, vector<2x32xf32>, vector<2x32xf32> -> vector<16x32xf32>
    %316 = tpu.concatenate %314, %276, %238, %200, %162, %124, %86, %48 in 0 : vector<2x32xf32>, vector<2x32xf32>, vector<2x32xf32>, vector<2x32xf32>, vector<2x32xf32>, vector<2x32xf32>, vector<2x32xf32>, vector<2x32xf32> -> vector<16x32xf32>
    %c0_42 = arith.constant 0 : index
    %c0_43 = arith.constant 0 : index
    %317 = vector.load %arg5[%c0_42, %c0_43] : memref<32x10xf32, #tpu.memory_space<vmem>>, vector<32x10xf32>
    %cst_44 = arith.constant dense<0.000000e+00> : vector<16x10xf32>
    %318 = tpu.matmul %315, %317, %cst_44 {dimension_numbers = #tpu.dot_dimension_numbers<[1], [0], [0], [1], [0, 0, 1, 1], [], []>} : vector<16x32xf32>, vector<32x10xf32>, vector<16x10xf32> -> vector<16x10xf32>
    %c0_45 = arith.constant 0 : index
    %c0_46 = arith.constant 0 : index
    %319 = vector.load %arg6[%c0_45, %c0_46] : memref<32x10xf32, #tpu.memory_space<vmem>>, vector<32x10xf32>
    %cst_47 = arith.constant dense<0.000000e+00> : vector<16x10xf32>
    %320 = tpu.matmul %316, %319, %cst_47 {dimension_numbers = #tpu.dot_dimension_numbers<[1], [0], [0], [1], [0, 0, 1, 1], [], []>} : vector<16x32xf32>, vector<32x10xf32>, vector<16x10xf32> -> vector<16x10xf32>
    %321 = arith.addf %318, %320 : vector<16x10xf32>
    %c0_48 = arith.constant 0 : index
    %c0_49 = arith.constant 0 : index
    %322 = vector.load %arg7[%c0_48, %c0_49] : memref<1x10xf32, #tpu.memory_space<vmem>>, vector<1x10xf32>
    %323 = vector.broadcast %322 : vector<1x10xf32> to vector<16x10xf32>
    %324 = arith.addf %321, %323 : vector<16x10xf32>
    %c0_50 = arith.constant 0 : index
    %c0_51 = arith.constant 0 : index
    %325 = vector.load %arg8[%c0_50, %c0_51] : memref<16x10xf32, #tpu.memory_space<vmem>>, vector<16x10xf32>
    tpu.vector_store %arg8[%c0_50, %c0_51], %324 {strides = array<i32>} : memref<16x10xf32, #tpu.memory_space<vmem>>, vector<16x10xf32>,
    return
  }
}

</mosaic_0001>

<bundles_post_ra>
// kernel: tpu_custom_call.1
= control target key start
LH: loop header
LB: loop body
LE: loop exit
PB: predicated region body
PF: predicated region fallthrough
CT: control target
= control target key end

     0   :  { %13 = vsyncpa [#allocation3], 0  ;;  %s3120_s0 = inlined_call_operand.hbm [shape: f32[16,10], index: 0, kind: input, shape index: {}]   ;;  %s3121_s1 = inlined_call_operand.vmem [shape: f32[10,256], index: 1, kind: input, shape index: {}]   ;;  %s3122_s2 = inlined_call_operand.vmem [shape: f32[1,256], index: 2, kind: input, shape index: {}]   ;;  %s3123_s3 = inlined_call_operand.vmem [shape: f32[32,128], index: 3, kind: input, shape index: {}]   ;;  %s3124_s4 = inlined_call_operand.vmem [shape: f32[32,128], index: 4, kind: input, shape index: {}]   ;;  %s3125_s5 = inlined_call_operand.vmem [shape: f32[32,10], index: 5, kind: input, shape index: {}]   ;;  %s3126_s6 = inlined_call_operand.vmem [shape: f32[32,10], index: 6, kind: input, shape index: {}]   ;;  %s3127_s7 = inlined_call_operand.vmem [shape: f32[1,10], index: 7, kind: input, shape index: {}]   ;;  %s3128_s8 = inlined_call_operand.hbm [shape: f32[16,10], index: 8, kind: output, shape index: {}]  }
   0x1   :  { %14 = vsyncpa [#allocation4], 0  ;;  %s2576_s27 = smov [#allocation2]  }
   0x2   :  { %s20_s28 = sshll.u32 %s2576_s27, 4  ;;  %s21_s28 = int_to_ptr.vmem [resolvable:$true] %s20_s28 }
   0x3   :  { %s2540_s29 = scalar_lea.vmem %s21_s28, 256  ;;  %p2545_p1 = scmp.lt.s32.totalorder %s21_s28, %s21_s28 }
   0x4   :  { %p2541_p0 = scmp.ne.s32.totalorder %s21_s28, %s2540_s29  ;;  %p2546_p2 = scmp.lt.s32.totalorder %s2540_s29, %s2540_s29 }
   0x6   :  { %p2547_p3 = por %p2546_p2, %p2545_p1 }
   0x8   :  { %p2548_p4 = pnand %p2547_p3, %p2541_p0 }
   0xa   :  { %2551 = shalt.err (!%p2548_p4)
}
   0xb   :  { %s2577_s30 = smov 128   ;;  %s2578_s9 = smov 8  }
   0xc   :  { %26 = dma.hbm_to_vmem [thread:$0]  %s3120_s0, 256, %s21_s28, [#allocation3], %s2577_s30, %s2577_s30, %s2578_s9  }
   0xd   :  { %2572 = dma.done.wait [#allocation3], 256  }
   0xe   :  { %2573 = vsyncadd [#allocation3], 4294967040  ;;  %v2579_v0 = vmov 0.0   ;;  %vm2580_vm0 = vmmov 0   ;;  %vm69_vm1 = vcmask 1041408   ;;  %v2645_v2 = vld [vmem:[%s3123_s3 + $0x18] sm:$0xff]  ;;  %v52_v15 = vlaneseq }
   0xf   :  { %2195 = vmatprep.subr.mxu1 %v2579_v0  ;;  %140 = vmatprep.mubr.f32.mxu0 %v2579_v0  ;;  %v49_v1 = vld [vmem:[%s3121_s1 + $0x18] sm:$0x3]  ;;  %v48_v3 = vld [vmem:[%s3121_s1 + $0x10] sm:$0x3]  ;;  %v47_v4 = vld [vmem:[%s3121_s1 + $0x8] sm:$0xff]  ;;  %vm62_vm2 = vcmask 80896  }
  0x10   :  { %2203 = vmatprep.mubr.msk.f32.mxu1 %vm2580_vm0, %v2579_v0  ;;  %2064 = vmatprep.subr.msk.mxu0 %vm69_vm1, %v49_v1  ;;  %v2658_v5 = vld [vmem:[%s3123_s3 + $0x10] sm:$0xff]  ;;  %v46_v6 = vld [vmem:[%s3121_s1] sm:$0xff]  ;;  %v2668_v8 = vld [vmem:[%s3123_s3 + $0x8] sm:$0xff]  ;;  %v53_v16 = vshrl.u32 %v52_v15, 7  ;;  %s2582_s15 = smov 64   ;;  %vm161_vm3 = vcmask 261120  }
  0x11   :  { %2196 = vmatpush3.msra.mxu1 %v2645_v2  ;;  %2065 = vmatpush1.msk.msra.mxu0 %vm69_vm1, %v48_v3  ;;  %v44_v7 = vld [vmem:[#allocation2] sm:$0xff]  ;;  %v2675_v9 = vld [vmem:[%s3124_s4 + $0x18] sm:$0xff]  ;;  %v2689_v11 = vld [vmem:[%s3124_s4 + $0x10] sm:$0xff]  ;;  %vm1845_vm4 = vcmask 1043456   ;;  %vm1847_vm5 = vcmask 1045504   ;;  %s2583_s14 = smov [#allocation5]  }
  0x12   :  { %2197 = vmatprep.subr.mxu1 %v2579_v0  ;;  %106 = vmatprep.subr.mxu0 %v47_v4  ;;  %v2680_v10 = vld [vmem:[%s3123_s3] sm:$0xff]  ;;  %v45_v12 = vld [vmem:[#allocation2 + $0x8] sm:$0xff]  ;;  %v58_v17 = vsub.s32 1, %v53_v16  ;;  %v54_v20 = vsub.s32 0, %v53_v16 }
  0x13   :  { %2198 = vmatpush3.msra.mxu1 %v2658_v5  ;;  %107 = vmatpush1.msra.mxu0 %v46_v6  ;;  %v2698_v13 = vld [vmem:[%s3124_s4 + $0x8] sm:$0xff]  ;;  %v2707_v14 = vld [vmem:[%s3124_s4] sm:$0xff] }
  0x14   :  { %2199 = vmatprep.subr.mxu1 %v2579_v0  ;;  %2066 = vmatmul.mubr.msk.f32.vlgmr.msra.gmra.mxu0 %vm62_vm2, %v44_v7  ;;  %v50_v18 = vld [vmem:[%s3122_s2] sm:$0x3]  ;;  %s2581_s2 = smov 32  }
  0x15   :  { %2200 = vmatpush3.msra.mxu1 %v2668_v8  ;;  %2206 = vmatprep.subr.mxu0 %v2579_v0  ;;  %v59_v19 = vrot.slane %v50_v18, %v58_v17  ;;  %v55_v24 = vrot.slane %v50_v18, %v54_v20 }
  0x16   :  { %2201 = vmatprep.subr.mxu1 %v2579_v0  ;;  %2207 = vmatpush3.msra.mxu0 %v2675_v9 }
  0x17   :  { %2202 = vmatpush3.msra.mxu1 %v2680_v10  ;;  %2208 = vmatprep.subr.mxu0 %v2579_v0 }
  0x18   :  { %146 = vmatprep.mubr.f32.mxu0 %v2579_v0  ;;  %2204 = vmatmul.mubr.f32.vlgmr.msra.gmra.mxu1 %v2579_v0 }
  0x19   :  { %2209 = vmatpush3.msra.mxu0 %v2689_v11  ;;  %2217 = vmatprep.subr.mxu1 %v2579_v0 }
  0x1a   :  { %2067 = vmatmul.mubr.msk.f32.gmra.mxu0 %vm62_vm2, %v45_v12  ;;  %2210 = vmatprep.subr.mxu0 %v2579_v0 }
  0x1b   :  { %2211 = vmatpush3.msra.mxu0 %v2698_v13  ;;  %2214 = vmatprep.mubr.msk.f32.mxu0 %vm2580_vm0, %v2579_v0 }
  0x1c   :  { %2212 = vmatprep.subr.mxu0 %v2579_v0  ;;  %2218 = vmatpush3.msra.mxu1 %v2645_v2 }
  0x1d   :  { %2213 = vmatpush3.msra.mxu0 %v2707_v14  ;;  %2219 = vmatprep.subr.mxu1 %v2579_v0 }
  0x1e   :  { %2215 = vmatmul.mubr.f32.vlgmr.msra.gmra.mxu0 %v2579_v0  ;;  %2228 = vmatprep.subr.mxu0 %v2579_v0 }
  0x1f   :  { %2229 = vmatpush3.msra.mxu0 %v2675_v9  ;;  %2220 = vmatpush3.msra.mxu1 %v2658_v5 }
  0x20   :  { %2230 = vmatprep.subr.mxu0 %v2579_v0  ;;  %2221 = vmatprep.subr.mxu1 %v2579_v0 }
  0x21   :  { %2231 = vmatpush3.msra.mxu0 %v2689_v11  ;;  %2222 = vmatpush3.msra.mxu1 %v2668_v8 }
  0x22   :  { %2232 = vmatprep.subr.mxu0 %v2579_v0  ;;  %2236 = vmatprep.mubr.msk.f32.mxu0 %vm2580_vm0, %v2579_v0 }
  0x23   :  { %2233 = vmatpush3.msra.mxu0 %v2698_v13  ;;  %2223 = vmatprep.subr.mxu1 %v2579_v0 }
  0x24   :  { %2234 = vmatprep.subr.mxu0 %v2579_v0  ;;  %2224 = vmatpush3.msra.mxu1 %v2680_v10 }
  0x25   :  { %2235 = vmatpush3.msra.mxu0 %v2707_v14  ;;  %2225 = vmatprep.mubr.msk.f32.mxu1 %vm2580_vm0, %v2579_v0 }
  0x26   :  { %2250 = vmatprep.subr.mxu0 %v2579_v0  ;;  %2239 = vmatprep.subr.mxu1 %v2579_v0 }
  0xd4   :  { %v142_v21 = vpop.f32.mrf.mxu0 }
  0xd5   :  { %v2744_v31 = vadd.f32 %v142_v21, %v55_v24 }
  0xd6   :  { %v144_v22 = vpop.f32.mrf.mxu0 }
  0xd7   :  { %v2740_v23 = vadd.f32 %v144_v22, %v59_v19 }
  0xd8   :  { %v231_v25 = vpop.f32.mrf.mxu1 }
  0xd9   :  { %v235_v36 = vadd.f32 %v231_v25, %v2744_v31 }
  0xda   :  { %v148_v26 = vpop.f32.mrf.mxu0  ;;  %v2205_v28 = vpop.f32.mrf.mxu1 }
  0xdb   :  { %v2742_v27 = vadd.f32 %v148_v26, %v55_v24  ;;  %v2068_v40 = vmul.f32 -1.442695, %v235_v36 }
  0xdc   :  { %v150_v29 = vpop.f32.mrf.mxu0 }
  0xdd   :  { %v2746_v32 = vadd.f32 %v150_v29, %v59_v19 }
  0xde   :  { %v326_v30 = vpop.f32.mrf.mxu0 }
  0xdf   :  { %v331_v33 = vrot.slane %v326_v30, 2 }
  0xe0   :  { %v2216_v34 = vpop.f32.mrf.mxu0 }
  0xe1   :  { %v333_v35 = vadd.f32 %v331_v33, %v2746_v32 }
  0xe3   :  { %2401 = vtanh.f32 %v333_v35  ;;  %v2069_v39 = vmul.f32 -1.442695, %v333_v35 }
  0xe4   :  { %2403 = vtanh.f32 %v235_v36 }
  0xe5   :  { %2405 = vpow2.f32 %v2069_v39 }
  0xe6   :  { %2407 = vpow2.f32 %v2068_v40 }
  0xf0   :  { %v2402_v37 = vpop.eup %2401 }
  0xf1   :  { %343 = vrot.lane.b32.xlu0 %v2402_v37, %s2581_s2  ;;  %v2404_v38 = vpop.eup %2403 }
  0xf2   :  { %v2406_v41 = vpop.eup %2405 }
  0xf3   :  { %v337_v42 = vadd.f32 1.0, %v2406_v41  ;;  %v2408_v43 = vpop.eup %2407 }
  0xf4   :  { %v239_v44 = vadd.f32 1.0, %v2408_v43 }
  0xf5   :  { %245 = vrot.lane.b32.xlu0 %v2404_v38, %s2581_s2  ;;  %2409 = vrcp.f32 %v337_v42 }
  0xf6   :  { %2411 = vrcp.f32 %v239_v44 }
 0x102   :  { %v2410_v45 = vpop.eup %2409 }
 0x103   :  { %v2412_v48 = vpop.eup %2411  ;;  %v341_v51 = vmul.f32 0.0, %v2410_v45 }
 0x104   :  { %v243_v54 = vmul.f32 0.0, %v2412_v48 }
 0x163   :  { %v344_v46 = vpop.permute.xlu0 %343 }
 0x164   :  { %v346_v47 = vmul.f32 %v2410_v45, %v344_v46 }
 0x166   :  { %348 = vrot.lane.b32.xlu1 %v346_v47, %s2581_s2 }
 0x167   :  { %v246_v49 = vpop.permute.xlu0 %245 }
 0x168   :  { %v248_v50 = vmul.f32 %v2412_v48, %v246_v49 }
 0x16a   :  { %250 = vrot.lane.b32.xlu1 %v248_v50, %s2581_s2 }
 0x1d8   :  { %v349_v52 = vpop.permute.xlu1 %348 }
 0x1d9   :  { %v2754_v53 = vadd.f32 %v349_v52, %v341_v51 }
 0x1db   :  { %2413 = vtanh.f32 %v2754_v53  ;;  %v552_v37 = vrot.slane %v2754_v53, 2 }
 0x1dc   :  { %v251_v55 = vpop.permute.xlu1 %250 }
 0x1dd   :  { %v2757_v56 = vadd.f32 %v251_v55, %v243_v54 }
 0x1df   :  { %2415 = vtanh.f32 %v2757_v56  ;;  %v445_v39 = vrot.slane %v2757_v56, 6 }
 0x1e8   :  { %v2414_v57 = vpop.eup %2413 }
 0x1e9   :  { %354 = vrot.lane.b32.xlu0 %v2414_v57, %s2581_s2 }
 0x1ec   :  { %v2416_v58 = vpop.eup %2415 }
 0x1ed   :  { %256 = vrot.lane.b32.xlu1 %v2416_v58, %s2581_s2 }
 0x25b   :  { %v355_v59 = vpop.permute.xlu0 %354 }
 0x25c   :  { %v2762_v60 = vmul.f32 %v2410_v45, %v355_v59 }
 0x25e   :  { %v465_v61 = vrot.slane %v2762_v60, 6 }
 0x25f   :  { %v257_v62 = vpop.permute.xlu1 %256 }
 0x260   :  { %v2765_v63 = vmul.f32 %v2412_v48, %v257_v62  ;;  %466 = vrot.lane.b32.xlu0 %v465_v61, %s2582_s15 }
 0x262   :  { %359 = vrot.lane.b32.xlu1 %v2765_v63, %s2582_s15 }
 0x2d2   :  { %v467_v1 = vpop.permute.xlu0 %466 }
 0x2d3   :  { %2237 = vmatmul.mubr.msk.f32.vlgmr.msra.gmra.mxu0 %vm161_vm3, %v467_v1 }
 0x2d4   :  { %v360_v3 = vpop.permute.xlu1 %359  ;;  %2251 = vmatpush3.msra.mxu0 %v2675_v9  ;;  %2258 = vmatprep.mubr.msk.f32.mxu0 %vm2580_vm0, %v2579_v0 }
 0x2d5   :  { %2226 = vmatmul.mubr.msk.f32.vlgmr.msra.gmra.mxu1 %vm161_vm3, %v360_v3  ;;  %2252 = vmatprep.subr.mxu0 %v2579_v0 }
 0x2d6   :  { %2240 = vmatpush3.msra.mxu1 %v2645_v2  ;;  %2253 = vmatpush3.msra.mxu0 %v2689_v11 }
 0x2d7   :  { %2241 = vmatprep.subr.mxu1 %v2579_v0  ;;  %2254 = vmatprep.subr.mxu0 %v2579_v0 }
 0x2d8   :  { %2242 = vmatpush3.msra.mxu1 %v2658_v5  ;;  %2255 = vmatpush3.msra.mxu0 %v2698_v13 }
 0x2d9   :  { %2243 = vmatprep.subr.mxu1 %v2579_v0  ;;  %2256 = vmatprep.subr.mxu0 %v2579_v0 }
 0x2da   :  { %2257 = vmatpush3.msra.mxu0 %v2707_v14  ;;  %2244 = vmatpush3.msra.mxu1 %v2668_v8 }
 0x2db   :  { %2245 = vmatprep.subr.mxu1 %v2579_v0  ;;  %2247 = vmatprep.mubr.msk.f32.mxu1 %vm2580_vm0, %v2579_v0 }
 0x2dc   :  { %2246 = vmatpush3.msra.mxu1 %v2680_v10  ;;  %2272 = vmatprep.subr.mxu0 %v2579_v0 }
 0x2dd   :  { %2261 = vmatprep.subr.mxu1 %v2579_v0 }
 0x393   :  { %v536_v4 = vpop.f32.mrf.mxu0 }
 0x394   :  { %v541_v6 = vrot.slane %v536_v4, 4 }
 0x395   :  { %v429_v7 = vpop.f32.mrf.mxu1  ;;  %v2238_v12 = vpop.f32.mrf.mxu0 }
 0x396   :  { %v543_v15 = vadd.f32 %v541_v6, %v2746_v32  ;;  %v434_v16 = vrot.slane %v429_v7, 6 }
 0x397   :  { %v2227_v17 = vpop.f32.mrf.mxu1 }
 0x398   :  { %2417 = vtanh.f32 %v543_v15  ;;  %v436_v18 = vadd.f32 %v434_v16, %v2744_v31  ;;  %v2073_v21 = vmul.f32 -1.442695, %v543_v15 }
 0x39a   :  { %2419 = vtanh.f32 %v436_v18  ;;  %v2071_v22 = vmul.f32 -1.442695, %v436_v18 }
 0x39b   :  { %2421 = vpow2.f32 %v2073_v21 }
 0x39c   :  { %2423 = vpow2.f32 %v2071_v22 }
 0x3a5   :  { %v2418_v19 = vpop.eup %2417 }
 0x3a6   :  { %556 = vrot.lane.b32.xlu0 %v2418_v19, %s2581_s2 }
 0x3a7   :  { %v2420_v20 = vpop.eup %2419 }
 0x3a8   :  { %449 = vrot.lane.b32.xlu1 %v2420_v20, %s2581_s2  ;;  %v2422_v24 = vpop.eup %2421 }
 0x3a9   :  { %v2424_v25 = vpop.eup %2423  ;;  %v547_v26 = vadd.f32 1.0, %v2422_v24 }
 0x3aa   :  { %v440_v28 = vadd.f32 1.0, %v2424_v25 }
 0x3ab   :  { %2425 = vrcp.f32 %v547_v26 }
 0x3ac   :  { %2427 = vrcp.f32 %v440_v28 }
 0x3b8   :  { %v2426_v29 = vpop.eup %2425 }
 0x3b9   :  { %v2428_v34 = vpop.eup %2427  ;;  %v554_v38 = vmul.f32 %v2426_v29, %v552_v37 }
 0x3ba   :  { %v447_v42 = vmul.f32 %v2428_v34, %v445_v39 }
 0x418   :  { %v557_v30 = vpop.permute.xlu0 %556 }
 0x419   :  { %v559_v33 = vmul.f32 %v2426_v29, %v557_v30 }
 0x41a   :  { %v450_v35 = vpop.permute.xlu1 %449 }
 0x41b   :  { %561 = vrot.lane.b32.xlu0 %v559_v33, %s2581_s2  ;;  %v452_v36 = vmul.f32 %v2428_v34, %v450_v35 }
 0x41d   :  { %454 = vrot.lane.b32.xlu1 %v452_v36, %s2581_s2 }
 0x48d   :  { %v562_v40 = vpop.permute.xlu0 %561 }
 0x48e   :  { %v2800_v41 = vadd.f32 %v562_v40, %v554_v38 }
 0x48f   :  { %v455_v43 = vpop.permute.xlu1 %454 }
 0x490   :  { %2429 = vtanh.f32 %v2800_v41  ;;  %v2803_v44 = vadd.f32 %v455_v43, %v447_v42  ;;  %v766_v25 = vrot.slane %v2800_v41, 2 }
 0x492   :  { %2431 = vtanh.f32 %v2803_v44  ;;  %v659_v28 = vrot.slane %v2803_v44, 6 }
 0x49d   :  { %v2430_v45 = vpop.eup %2429 }
 0x49e   :  { %567 = vrot.lane.b32.xlu0 %v2430_v45, %s2581_s2 }
 0x49f   :  { %v2432_v46 = vpop.eup %2431 }
 0x4a0   :  { %460 = vrot.lane.b32.xlu1 %v2432_v46, %s2581_s2 }
 0x510   :  { %v568_v47 = vpop.permute.xlu0 %567 }
 0x511   :  { %v2808_v48 = vmul.f32 %v2426_v29, %v568_v47 }
 0x512   :  { %v461_v50 = vpop.permute.xlu1 %460 }
 0x513   :  { %v679_v49 = vrot.slane %v2808_v48, 4  ;;  %v2811_v51 = vmul.f32 %v2428_v34, %v461_v50 }
 0x515   :  { %680 = vrot.lane.b32.xlu0 %v679_v49, %s2582_s15  ;;  %v572_v52 = vrot.slane %v2811_v51, 2  ;;  %v1844_v43 = vsel %vm69_vm1, %v2765_v63, %v2811_v51 }
 0x517   :  { %573 = vrot.lane.b32.xlu1 %v572_v52, %s2582_s15 }
 0x587   :  { %v681_v53 = vpop.permute.xlu0 %680 }
 0x588   :  { %2259 = vmatmul.mubr.msk.f32.vlgmr.msra.gmra.mxu0 %vm161_vm3, %v681_v53 }
 0x589   :  { %2273 = vmatpush3.msra.mxu0 %v2675_v9  ;;  %2280 = vmatprep.mubr.msk.f32.mxu0 %vm2580_vm0, %v2579_v0  ;;  %v574_v54 = vpop.permute.xlu1 %573 }
 0x58a   :  { %2274 = vmatprep.subr.mxu0 %v2579_v0  ;;  %2248 = vmatmul.mubr.msk.f32.vlgmr.msra.gmra.mxu1 %vm161_vm3, %v574_v54 }
 0x58b   :  { %2275 = vmatpush3.msra.mxu0 %v2689_v11  ;;  %2262 = vmatpush3.msra.mxu1 %v2645_v2 }
 0x58c   :  { %2276 = vmatprep.subr.mxu0 %v2579_v0  ;;  %2263 = vmatprep.subr.mxu1 %v2579_v0 }
 0x58d   :  { %2277 = vmatpush3.msra.mxu0 %v2698_v13  ;;  %2264 = vmatpush3.msra.mxu1 %v2658_v5 }
 0x58e   :  { %2278 = vmatprep.subr.mxu0 %v2579_v0  ;;  %2265 = vmatprep.subr.mxu1 %v2579_v0 }
 0x58f   :  { %2279 = vmatpush3.msra.mxu0 %v2707_v14  ;;  %2266 = vmatpush3.msra.mxu1 %v2668_v8 }
 0x590   :  { %2269 = vmatprep.mubr.msk.f32.mxu1 %vm2580_vm0, %v2579_v0  ;;  %2267 = vmatprep.subr.mxu1 %v2579_v0 }
 0x591   :  { %2294 = vmatprep.subr.mxu0 %v2579_v0  ;;  %2268 = vmatpush3.msra.mxu1 %v2680_v10 }
 0x592   :  { %2283 = vmatprep.subr.mxu1 %v2579_v0 }
 0x648   :  { %v750_v55 = vpop.f32.mrf.mxu0 }
 0x649   :  { %v755_v56 = vrot.slane %v750_v55, 6 }
 0x64a   :  { %v2260_v57 = vpop.f32.mrf.mxu0  ;;  %v643_v59 = vpop.f32.mrf.mxu1 }
 0x64b   :  { %v757_v58 = vadd.f32 %v755_v56, %v2746_v32  ;;  %v648_v61 = vrot.slane %v643_v59, 4 }
 0x64c   :  { %v2249_v62 = vpop.f32.mrf.mxu1 }
 0x64d   :  { %2433 = vtanh.f32 %v757_v58  ;;  %v650_v1 = vadd.f32 %v648_v61, %v2744_v31  ;;  %v2077_v6 = vmul.f32 -1.442695, %v757_v58 }
 0x64f   :  { %2435 = vtanh.f32 %v650_v1  ;;  %v2075_v7 = vmul.f32 -1.442695, %v650_v1 }
 0x650   :  { %2437 = vpow2.f32 %v2077_v6 }
 0x651   :  { %2439 = vpow2.f32 %v2075_v7 }
 0x65a   :  { %v2434_v3 = vpop.eup %2433 }
 0x65b   :  { %770 = vrot.lane.b32.xlu0 %v2434_v3, %s2581_s2 }
 0x65c   :  { %v2436_v4 = vpop.eup %2435 }
 0x65d   :  { %663 = vrot.lane.b32.xlu1 %v2436_v4, %s2581_s2  ;;  %v2438_v12 = vpop.eup %2437 }
 0x65e   :  { %v2440_v15 = vpop.eup %2439  ;;  %v761_v16 = vadd.f32 1.0, %v2438_v12 }
 0x65f   :  { %v654_v17 = vadd.f32 1.0, %v2440_v15 }
 0x660   :  { %2441 = vrcp.f32 %v761_v16 }
 0x661   :  { %2443 = vrcp.f32 %v654_v17 }
 0x66d   :  { %v2442_v18 = vpop.eup %2441 }
 0x66e   :  { %v2444_v21 = vpop.eup %2443  ;;  %v768_v26 = vmul.f32 %v2442_v18, %v766_v25 }
 0x66f   :  { %v661_v33 = vmul.f32 %v2444_v21, %v659_v28 }
 0x6cd   :  { %v771_v19 = vpop.permute.xlu0 %770 }
 0x6ce   :  { %v773_v20 = vmul.f32 %v2442_v18, %v771_v19 }
 0x6cf   :  { %v664_v22 = vpop.permute.xlu1 %663 }
 0x6d0   :  { %775 = vrot.lane.b32.xlu0 %v773_v20, %s2581_s2  ;;  %v666_v24 = vmul.f32 %v2444_v21, %v664_v22 }
 0x6d2   :  { %668 = vrot.lane.b32.xlu1 %v666_v24, %s2581_s2 }
 0x742   :  { %v776_v29 = vpop.permute.xlu0 %775 }
 0x743   :  { %v2846_v30 = vadd.f32 %v776_v29, %v768_v26 }
 0x744   :  { %v669_v34 = vpop.permute.xlu1 %668 }
 0x745   :  { %2445 = vtanh.f32 %v2846_v30  ;;  %v2849_v35 = vadd.f32 %v669_v34, %v661_v33  ;;  %v977_v12 = vrot.slane %v2846_v30, 2 }
 0x747   :  { %2447 = vtanh.f32 %v2849_v35 }
 0x752   :  { %v2446_v36 = vpop.eup %2445 }
 0x753   :  { %781 = vrot.lane.b32.xlu0 %v2446_v36, %s2581_s2 }
 0x754   :  { %v2448_v37 = vpop.eup %2447 }
 0x755   :  { %674 = vrot.lane.b32.xlu1 %v2448_v37, %s2581_s2 }
 0x7c5   :  { %v782_v38 = vpop.permute.xlu0 %781 }
 0x7c6   :  { %v2854_v39 = vmul.f32 %v2442_v18, %v782_v38  ;;  %v873_v18 = vrot.slane %v2849_v35, 6 }
 0x7c7   :  { %v675_v41 = vpop.permute.xlu1 %674 }
 0x7c8   :  { %v893_v40 = vrot.slane %v2854_v39, 2  ;;  %v677_v42 = vmul.f32 %v2444_v21, %v675_v41 }
 0x7ca   :  { %894 = vrot.lane.b32.xlu0 %v893_v40, %s2582_s15  ;;  %v786_v44 = vrot.slane %v677_v42, 4  ;;  %v2862_v45 = vsel %vm1845_vm4, %v1844_v43, %v677_v42 }
 0x7cc   :  { %787 = vrot.lane.b32.xlu1 %v786_v44, %s2582_s15 }
 0x83c   :  { %v895_v46 = vpop.permute.xlu0 %894 }
 0x83d   :  { %2281 = vmatmul.mubr.msk.f32.vlgmr.msra.gmra.mxu0 %vm161_vm3, %v895_v46 }
 0x83e   :  { %2295 = vmatpush3.msra.mxu0 %v2675_v9  ;;  %2302 = vmatprep.mubr.msk.f32.mxu0 %vm2580_vm0, %v2579_v0  ;;  %v788_v47 = vpop.permute.xlu1 %787 }
 0x83f   :  { %2296 = vmatprep.subr.mxu0 %v2579_v0  ;;  %2270 = vmatmul.mubr.msk.f32.vlgmr.msra.gmra.mxu1 %vm161_vm3, %v788_v47 }
 0x840   :  { %2297 = vmatpush3.msra.mxu0 %v2689_v11  ;;  %2284 = vmatpush3.msra.mxu1 %v2645_v2 }
 0x841   :  { %2298 = vmatprep.subr.mxu0 %v2579_v0  ;;  %2285 = vmatprep.subr.mxu1 %v2579_v0 }
 0x842   :  { %2299 = vmatpush3.msra.mxu0 %v2698_v13  ;;  %2286 = vmatpush3.msra.mxu1 %v2658_v5 }
 0x843   :  { %2300 = vmatprep.subr.mxu0 %v2579_v0  ;;  %2287 = vmatprep.subr.mxu1 %v2579_v0 }
 0x844   :  { %2301 = vmatpush3.msra.mxu0 %v2707_v14  ;;  %2288 = vmatpush3.msra.mxu1 %v2668_v8 }
 0x845   :  { %2291 = vmatprep.mubr.msk.f32.mxu1 %vm2580_vm0, %v2579_v0  ;;  %2289 = vmatprep.subr.mxu1 %v2579_v0 }
 0x846   :  { %2316 = vmatprep.subr.mxu0 %v2579_v0  ;;  %2290 = vmatpush3.msra.mxu1 %v2680_v10 }
 0x847   :  { %2305 = vmatprep.subr.mxu1 %v2579_v0 }
 0x8fd   :  { %v964_v63 = vpop.f32.mrf.mxu0 }
 0x8fe   :  { %v968_v49 = vadd.f32 %v964_v63, %v2746_v32 }
 0x8ff   :  { %v2282_v50 = vpop.f32.mrf.mxu0  ;;  %v857_v51 = vpop.f32.mrf.mxu1 }
 0x900   :  { %2449 = vtanh.f32 %v968_v49  ;;  %v862_v52 = vrot.slane %v857_v51, 2  ;;  %v2081_v57 = vmul.f32 -1.442695, %v968_v49 }
 0x901   :  { %v2271_v53 = vpop.f32.mrf.mxu1 }
 0x902   :  { %v864_v54 = vadd.f32 %v862_v52, %v2744_v31 }
 0x904   :  { %2451 = vtanh.f32 %v864_v54  ;;  %v2079_v58 = vmul.f32 -1.442695, %v864_v54 }
 0x905   :  { %2453 = vpow2.f32 %v2081_v57 }
 0x906   :  { %2455 = vpow2.f32 %v2079_v58 }
 0x90d   :  { %v2450_v55 = vpop.eup %2449 }
 0x90e   :  { %981 = vrot.lane.b32.xlu0 %v2450_v55, %s2581_s2 }
 0x911   :  { %v2452_v56 = vpop.eup %2451 }
 0x912   :  { %877 = vrot.lane.b32.xlu1 %v2452_v56, %s2581_s2  ;;  %v2454_v59 = vpop.eup %2453 }
 0x913   :  { %v972_v32 = vadd.f32 1.0, %v2454_v59  ;;  %v2456_v61 = vpop.eup %2455 }
 0x914   :  { %v868_v62 = vadd.f32 1.0, %v2456_v61 }
 0x915   :  { %2457 = vrcp.f32 %v972_v32 }
 0x916   :  { %2459 = vrcp.f32 %v868_v62 }
 0x922   :  { %v2458_v1 = vpop.eup %2457 }
 0x923   :  { %v2460_v4 = vpop.eup %2459  ;;  %v979_v15 = vmul.f32 %v2458_v1, %v977_v12 }
 0x924   :  { %v875_v19 = vmul.f32 %v2460_v4, %v873_v18 }
 0x980   :  { %v982_v3 = vpop.permute.xlu0 %981 }
 0x981   :  { %v984_v31 = vmul.f32 %v2458_v1, %v982_v3 }
 0x983   :  { %986 = vrot.lane.b32.xlu0 %v984_v31, %s2581_s2 }
 0x984   :  { %v878_v6 = vpop.permute.xlu1 %877 }
 0x985   :  { %v880_v7 = vmul.f32 %v2460_v4, %v878_v6 }
 0x987   :  { %882 = vrot.lane.b32.xlu1 %v880_v7, %s2581_s2 }
 0x9f5   :  { %v987_v16 = vpop.permute.xlu0 %986 }
 0x9f6   :  { %v2894_v17 = vadd.f32 %v987_v16, %v979_v15 }
 0x9f8   :  { %2461 = vtanh.f32 %v2894_v17  ;;  %v1187_v58 = vrot.slane %v2894_v17, 2 }
 0x9f9   :  { %v883_v20 = vpop.permute.xlu1 %882 }
 0x9fa   :  { %v2898_v21 = vadd.f32 %v883_v20, %v875_v19 }
 0x9fc   :  { %2463 = vtanh.f32 %v2898_v21  ;;  %v1081_v62 = vrot.slane %v2898_v21, 6 }
 0xa05   :  { %v2462_v22 = vpop.eup %2461 }
 0xa06   :  { %992 = vrot.lane.b32.xlu0 %v2462_v22, %s2581_s2 }
 0xa09   :  { %v2464_v24 = vpop.eup %2463 }
 0xa0a   :  { %888 = vrot.lane.b32.xlu1 %v2464_v24, %s2581_s2 }
 0xa78   :  { %v993_v25 = vpop.permute.xlu0 %992 }
 0xa79   :  { %v2903_v26 = vmul.f32 %v2458_v1, %v993_v25 }
 0xa7b   :  { %1101 = vrot.lane.b32.xlu0 %v2903_v26, %s2582_s15 }
 0xa7c   :  { %v889_v28 = vpop.permute.xlu1 %888 }
 0xa7d   :  { %v891_v29 = vmul.f32 %v2460_v4, %v889_v28 }
 0xa7f   :  { %v997_v30 = vrot.slane %v891_v29, 6  ;;  %v2909_v33 = vsel %vm1847_vm5, %v2862_v45, %v891_v29 }
 0xa81   :  { %998 = vrot.lane.b32.xlu1 %v997_v30, %s2582_s15 }
 0xaed   :  { %v1102_v34 = vpop.permute.xlu0 %1101 }
 0xaee   :  { %2303 = vmatmul.mubr.msk.f32.vlgmr.msra.gmra.mxu0 %vm161_vm3, %v1102_v34 }
 0xaef   :  { %2317 = vmatpush3.msra.mxu0 %v2675_v9  ;;  %2324 = vmatprep.mubr.msk.f32.mxu0 %vm2580_vm0, %v2579_v0 }
 0xaf0   :  { %2318 = vmatprep.subr.mxu0 %v2579_v0 }
 0xaf1   :  { %2319 = vmatpush3.msra.mxu0 %v2689_v11 }
 0xaf2   :  { %2320 = vmatprep.subr.mxu0 %v2579_v0 }
 0xaf3   :  { %2321 = vmatpush3.msra.mxu0 %v2698_v13  ;;  %v999_v35 = vpop.permute.xlu1 %998 }
 0xaf4   :  { %2322 = vmatprep.subr.mxu0 %v2579_v0  ;;  %2292 = vmatmul.mubr.msk.f32.vlgmr.msra.gmra.mxu1 %vm161_vm3, %v999_v35 }
 0xaf5   :  { %2323 = vmatpush3.msra.mxu0 %v2707_v14  ;;  %2306 = vmatpush3.msra.mxu1 %v2645_v2 }
 0xaf6   :  { %2313 = vmatprep.mubr.msk.f32.mxu1 %vm2580_vm0, %v2579_v0  ;;  %2307 = vmatprep.subr.mxu1 %v2579_v0 }
 0xaf7   :  { %2338 = vmatprep.subr.mxu0 %v2579_v0  ;;  %2308 = vmatpush3.msra.mxu1 %v2658_v5 }
 0xaf8   :  { %2309 = vmatprep.subr.mxu1 %v2579_v0 }
 0xaf9   :  { %2310 = vmatpush3.msra.mxu1 %v2668_v8 }
 0xafa   :  { %2311 = vmatprep.subr.mxu1 %v2579_v0 }
 0xafb   :  { %2312 = vmatpush3.msra.mxu1 %v2680_v10 }
 0xafc   :  { %2327 = vmatprep.subr.mxu1 %v2579_v0 }
 0xbae   :  { %v1171_v36 = vpop.f32.mrf.mxu0 }
 0xbaf   :  { %v1176_v37 = vrot.slane %v1171_v36, 2 }
 0xbb0   :  { %v2304_v38 = vpop.f32.mrf.mxu0 }
 0xbb1   :  { %v1178_v40 = vadd.f32 %v1176_v37, %v2740_v23 }
 0xbb3   :  { %2465 = vtanh.f32 %v1178_v40  ;;  %v2085_v46 = vmul.f32 -1.442695, %v1178_v40 }
 0xbb4   :  { %v1068_v41 = vpop.f32.mrf.mxu1 }
 0xbb5   :  { %v1072_v42 = vadd.f32 %v1068_v41, %v2742_v27 }
 0xbb6   :  { %v2293_v43 = vpop.f32.mrf.mxu1 }
 0xbb7   :  { %2467 = vtanh.f32 %v1072_v42  ;;  %v2083_v47 = vmul.f32 -1.442695, %v1072_v42 }
 0xbb8   :  { %2469 = vpow2.f32 %v2085_v46 }
 0xbb9   :  { %2471 = vpow2.f32 %v2083_v47 }
 0xbc0   :  { %v2466_v44 = vpop.eup %2465 }
 0xbc1   :  { %1191 = vrot.lane.b32.xlu0 %v2466_v44, %s2581_s2 }
 0xbc4   :  { %v2468_v45 = vpop.eup %2467 }
 0xbc5   :  { %1085 = vrot.lane.b32.xlu1 %v2468_v45, %s2581_s2  ;;  %v2470_v63 = vpop.eup %2469 }
 0xbc6   :  { %v1182_v49 = vadd.f32 1.0, %v2470_v63  ;;  %v2472_v50 = vpop.eup %2471 }
 0xbc7   :  { %v1076_v51 = vadd.f32 1.0, %v2472_v50 }
 0xbc8   :  { %2473 = vrcp.f32 %v1182_v49 }
 0xbc9   :  { %2475 = vrcp.f32 %v1076_v51 }
 0xbd5   :  { %v2474_v52 = vpop.eup %2473 }
 0xbd6   :  { %v2476_v55 = vpop.eup %2475  ;;  %v1189_v59 = vmul.f32 %v2474_v52, %v1187_v58 }
 0xbd7   :  { %v1083_v1 = vmul.f32 %v2476_v55, %v1081_v62 }
 0xc33   :  { %v1192_v53 = vpop.permute.xlu0 %1191 }
 0xc34   :  { %v1194_v54 = vmul.f32 %v2474_v52, %v1192_v53 }
 0xc36   :  { %1196 = vrot.lane.b32.xlu0 %v1194_v54, %s2581_s2 }
 0xc37   :  { %v1086_v56 = vpop.permute.xlu1 %1085 }
 0xc38   :  { %v1088_v57 = vmul.f32 %v2476_v55, %v1086_v56 }
 0xc3a   :  { %1090 = vrot.lane.b32.xlu1 %v1088_v57, %s2581_s2 }
 0xca8   :  { %v1197_v32 = vpop.permute.xlu0 %1196 }
 0xca9   :  { %v2941_v61 = vadd.f32 %v1197_v32, %v1189_v59 }
 0xcab   :  { %2477 = vtanh.f32 %v2941_v61  ;;  %v1400_v46 = vrot.slane %v2941_v61, 2 }
 0xcac   :  { %v1091_v3 = vpop.permute.xlu1 %1090 }
 0xcad   :  { %v2945_v31 = vadd.f32 %v1091_v3, %v1083_v1  ;;  %v2529_v3 = vld [vmem:[%s3123_s3 + $0x18] sm:$0xff] }
 0xcaf   :  { %2479 = vtanh.f32 %v2945_v31  ;;  %v1293_v63 = vrot.slane %v2945_v31, 6 }
 0xcb8   :  { %v2478_v4 = vpop.eup %2477 }
 0xcb9   :  { %1202 = vrot.lane.b32.xlu0 %v2478_v4, %s2581_s2 }
 0xcbc   :  { %v2480_v6 = vpop.eup %2479 }
 0xcbd   :  { %1096 = vrot.lane.b32.xlu1 %v2480_v6, %s2581_s2 }
 0xd2b   :  { %v1203_v7 = vpop.permute.xlu0 %1202 }
 0xd2c   :  { %v2950_v12 = vmul.f32 %v2474_v52, %v1203_v7 }
 0xd2e   :  { %v1313_v15 = vrot.slane %v2950_v12, 6 }
 0xd2f   :  { %v1097_v16 = vpop.permute.xlu1 %1096 }
 0xd30   :  { %1314 = vrot.lane.b32.xlu0 %v1313_v15, %s2582_s15  ;;  %v2954_v17 = vmul.f32 %v2476_v55, %v1097_v16 }
 0xd32   :  { %1207 = vrot.lane.b32.xlu1 %v2954_v17, %s2582_s15 }
 0xda2   :  { %v1315_v18 = vpop.permute.xlu0 %1314 }
 0xda3   :  { %2325 = vmatmul.mubr.msk.f32.vlgmr.msra.gmra.mxu0 %vm161_vm3, %v1315_v18 }
 0xda4   :  { %2339 = vmatpush3.msra.mxu0 %v2675_v9  ;;  %2346 = vmatprep.mubr.msk.f32.mxu0 %vm2580_vm0, %v2579_v0  ;;  %v1208_v19 = vpop.permute.xlu1 %1207 }
 0xda5   :  { %2340 = vmatprep.subr.mxu0 %v2579_v0  ;;  %2314 = vmatmul.mubr.msk.f32.vlgmr.msra.gmra.mxu1 %vm161_vm3, %v1208_v19 }
 0xda6   :  { %2341 = vmatpush3.msra.mxu0 %v2689_v11  ;;  %2328 = vmatpush3.msra.mxu1 %v2645_v2 }
 0xda7   :  { %2342 = vmatprep.subr.mxu0 %v2579_v0  ;;  %2329 = vmatprep.subr.mxu1 %v2579_v0 }
 0xda8   :  { %2343 = vmatpush3.msra.mxu0 %v2698_v13  ;;  %2330 = vmatpush3.msra.mxu1 %v2658_v5 }
 0xda9   :  { %2344 = vmatprep.subr.mxu0 %v2579_v0  ;;  %2331 = vmatprep.subr.mxu1 %v2579_v0 }
 0xdaa   :  { %2345 = vmatpush3.msra.mxu0 %v2707_v14  ;;  %2332 = vmatpush3.msra.mxu1 %v2668_v8 }
 0xdab   :  { %2335 = vmatprep.mubr.msk.f32.mxu1 %vm2580_vm0, %v2579_v0  ;;  %2333 = vmatprep.subr.mxu1 %v2579_v0 }
 0xdac   :  { %2360 = vmatprep.subr.mxu0 %v2579_v0  ;;  %2334 = vmatpush3.msra.mxu1 %v2680_v10 }
 0xdad   :  { %2349 = vmatprep.subr.mxu1 %v2579_v0 }
 0xe63   :  { %v1384_v2 = vpop.f32.mrf.mxu0 }
 0xe64   :  { %v1389_v5 = vrot.slane %v1384_v2, 4 }
 0xe65   :  { %v2326_v20 = vpop.f32.mrf.mxu0  ;;  %v1277_v22 = vpop.f32.mrf.mxu1 }
 0xe66   :  { %v1391_v21 = vadd.f32 %v1389_v5, %v2740_v23  ;;  %v1282_v24 = vrot.slane %v1277_v22, 6 }
 0xe67   :  { %v2315_v8 = vpop.f32.mrf.mxu1 }
 0xe68   :  { %2481 = vtanh.f32 %v1391_v21  ;;  %v1284_v25 = vadd.f32 %v1282_v24, %v2742_v27  ;;  %v2089_v30 = vmul.f32 -1.442695, %v1391_v21 }
 0xe6a   :  { %2483 = vtanh.f32 %v1284_v25  ;;  %v2087_v34 = vmul.f32 -1.442695, %v1284_v25 }
 0xe6b   :  { %2485 = vpow2.f32 %v2089_v30 }
 0xe6c   :  { %2487 = vpow2.f32 %v2087_v34 }
 0xe75   :  { %v2482_v28 = vpop.eup %2481 }
 0xe76   :  { %1404 = vrot.lane.b32.xlu0 %v2482_v28, %s2581_s2 }
 0xe77   :  { %v2484_v29 = vpop.eup %2483 }
 0xe78   :  { %1297 = vrot.lane.b32.xlu1 %v2484_v29, %s2581_s2  ;;  %v2486_v35 = vpop.eup %2485 }
 0xe79   :  { %v2488_v36 = vpop.eup %2487  ;;  %v1395_v37 = vadd.f32 1.0, %v2486_v35 }
 0xe7a   :  { %v1288_v38 = vadd.f32 1.0, %v2488_v36 }
 0xe7b   :  { %2489 = vrcp.f32 %v1395_v37 }
 0xe7c   :  { %2491 = vrcp.f32 %v1288_v38 }
 0xe88   :  { %v2490_v40 = vpop.eup %2489 }
 0xe89   :  { %v2492_v43 = vpop.eup %2491  ;;  %v1402_v47 = vmul.f32 %v2490_v40, %v1400_v46 }
 0xe8a   :  { %v1295_v51 = vmul.f32 %v2492_v43, %v1293_v63 }
 0xee8   :  { %v1405_v41 = vpop.permute.xlu0 %1404 }
 0xee9   :  { %v1407_v42 = vmul.f32 %v2490_v40, %v1405_v41 }
 0xeea   :  { %v1298_v44 = vpop.permute.xlu1 %1297 }
 0xeeb   :  { %1409 = vrot.lane.b32.xlu0 %v1407_v42, %s2581_s2  ;;  %v1300_v45 = vmul.f32 %v2492_v43, %v1298_v44 }
 0xeed   :  { %1302 = vrot.lane.b32.xlu1 %v1300_v45, %s2581_s2 }
 0xf5d   :  { %v1410_v49 = vpop.permute.xlu0 %1409 }
 0xf5e   :  { %v2988_v50 = vadd.f32 %v1410_v49, %v1402_v47 }
 0xf5f   :  { %v1303_v52 = vpop.permute.xlu1 %1302 }
 0xf60   :  { %2493 = vtanh.f32 %v2988_v50  ;;  %v2991_v53 = vadd.f32 %v1303_v52, %v1295_v51  ;;  %v1614_v30 = vrot.slane %v2988_v50, 2 }
 0xf62   :  { %2495 = vtanh.f32 %v2991_v53  ;;  %v1507_v35 = vrot.slane %v2991_v53, 6 }
 0xf6d   :  { %v2494_v54 = vpop.eup %2493 }
 0xf6e   :  { %1415 = vrot.lane.b32.xlu0 %v2494_v54, %s2581_s2 }
 0xf6f   :  { %v2496_v55 = vpop.eup %2495 }
 0xf70   :  { %1308 = vrot.lane.b32.xlu1 %v2496_v55, %s2581_s2 }
 0xfe0   :  { %v1416_v56 = vpop.permute.xlu0 %1415 }
 0xfe1   :  { %v2996_v57 = vmul.f32 %v2490_v40, %v1416_v56 }
 0xfe2   :  { %v1309_v59 = vpop.permute.xlu1 %1308 }
 0xfe3   :  { %v1527_v58 = vrot.slane %v2996_v57, 4  ;;  %v2999_v32 = vmul.f32 %v2492_v43, %v1309_v59 }
 0xfe5   :  { %1528 = vrot.lane.b32.xlu0 %v1527_v58, %s2582_s15  ;;  %v1420_v61 = vrot.slane %v2999_v32, 2  ;;  %v1849_v49 = vsel %vm69_vm1, %v2954_v17, %v2999_v32 }
 0xfe7   :  { %1421 = vrot.lane.b32.xlu1 %v1420_v61, %s2582_s15 }
0x1057   :  { %v1529_v62 = vpop.permute.xlu0 %1528 }
0x1058   :  { %2347 = vmatmul.mubr.msk.f32.vlgmr.msra.gmra.mxu0 %vm161_vm3, %v1529_v62 }
0x1059   :  { %2361 = vmatpush3.msra.mxu0 %v2675_v9  ;;  %2368 = vmatprep.mubr.msk.f32.mxu0 %vm2580_vm0, %v2579_v0  ;;  %v1422_v1 = vpop.permute.xlu1 %1421  ;;  %v2530_v9 = vld [vmem:[%s3123_s3 + $0x10] sm:$0xff] }
0x105a   :  { %2362 = vmatprep.subr.mxu0 %v2579_v0  ;;  %2336 = vmatmul.mubr.msk.f32.vlgmr.msra.gmra.mxu1 %vm161_vm3, %v1422_v1 }
0x105b   :  { %2363 = vmatpush3.msra.mxu0 %v2689_v11  ;;  %2350 = vmatpush3.msra.mxu1 %v2529_v3  ;;  %v2531_v11 = vld [vmem:[%s3123_s3 + $0x8] sm:$0xff] }
0x105c   :  { %2364 = vmatprep.subr.mxu0 %v2579_v0  ;;  %2351 = vmatprep.subr.mxu1 %v2579_v0 }
0x105d   :  { %2365 = vmatpush3.msra.mxu0 %v2698_v13  ;;  %2352 = vmatpush3.msra.mxu1 %v2530_v9 }
0x105e   :  { %2366 = vmatprep.subr.mxu0 %v2579_v0  ;;  %2353 = vmatprep.subr.mxu1 %v2579_v0 }
0x105f   :  { %2367 = vmatpush3.msra.mxu0 %v2707_v14  ;;  %2354 = vmatpush3.msra.mxu1 %v2531_v11 }
0x1060   :  { %2357 = vmatprep.mubr.msk.f32.mxu1 %vm2580_vm0, %v2579_v0  ;;  %2355 = vmatprep.subr.mxu1 %v2579_v0 }
0x1061   :  { %2356 = vmatpush3.msra.mxu1 %v2680_v10 }
0x1118   :  { %v1598_v13 = vpop.f32.mrf.mxu0 }
0x1119   :  { %v1603_v31 = vrot.slane %v1598_v13, 6 }
0x111a   :  { %v2348_v4 = vpop.f32.mrf.mxu0  ;;  %v1491_v7 = vpop.f32.mrf.mxu1 }
0x111b   :  { %v1605_v6 = vadd.f32 %v1603_v31, %v2740_v23  ;;  %v1496_v15 = vrot.slane %v1491_v7, 4 }
0x111c   :  { %v2337_v14 = vpop.f32.mrf.mxu1 }
0x111d   :  { %2497 = vtanh.f32 %v1605_v6  ;;  %v1498_v16 = vadd.f32 %v1496_v15, %v2742_v27  ;;  %v2093_v0 = vmul.f32 -1.442695, %v1605_v6 }
0x111f   :  { %2499 = vtanh.f32 %v1498_v16  ;;  %v2091_v10 = vmul.f32 -1.442695, %v1498_v16 }
0x1120   :  { %2501 = vpow2.f32 %v2093_v0 }
0x1121   :  { %2503 = vpow2.f32 %v2091_v10 }
0x112a   :  { %v2498_v18 = vpop.eup %2497 }
0x112b   :  { %1618 = vrot.lane.b32.xlu0 %v2498_v18, %s2581_s2 }
0x112c   :  { %v2500_v19 = vpop.eup %2499 }
0x112d   :  { %1511 = vrot.lane.b32.xlu1 %v2500_v19, %s2581_s2  ;;  %v2502_v2 = vpop.eup %2501 }
0x112e   :  { %v2504_v5 = vpop.eup %2503  ;;  %v1609_v20 = vadd.f32 1.0, %v2502_v2 }
0x112f   :  { %v1502_v21 = vadd.f32 1.0, %v2504_v5 }
0x1130   :  { %2505 = vrcp.f32 %v1609_v20  ;;  %v1861_v20 = vld [vmem:[%s3125_s5 + $0x18] sm:$0xff] }
0x1131   :  { %2507 = vrcp.f32 %v1502_v21  ;;  %v1865_v21 = vld [vmem:[%s3126_s6 + $0x18] sm:$0xff]  ;;  %2382 = vmatprep.subr.mxu0 %v1861_v20 }
0x1132   :  { %2371 = vmatprep.subr.mxu1 %v1865_v21 }
0x113d   :  { %v2506_v22 = vpop.eup %2505 }
0x113e   :  { %v2508_v25 = vpop.eup %2507  ;;  %v1616_v34 = vmul.f32 %v2506_v22, %v1614_v30  ;;  %v1858_v30 = vld [vmem:[%s3125_s5] sm:$0xff] }
0x113f   :  { %v1509_v38 = vmul.f32 %v2508_v25, %v1507_v35 }
0x119d   :  { %v1619_v24 = vpop.permute.xlu0 %1618 }
0x119e   :  { %v1621_v8 = vmul.f32 %v2506_v22, %v1619_v24  ;;  %v1864_v24 = vld [vmem:[%s3126_s6 + $0x10] sm:$0xff] }
0x119f   :  { %v1512_v28 = vpop.permute.xlu1 %1511 }
0x11a0   :  { %1623 = vrot.lane.b32.xlu0 %v1621_v8, %s2581_s2  ;;  %v1514_v29 = vmul.f32 %v2508_v25, %v1512_v28  ;;  %v1859_v8 = vld [vmem:[%s3125_s5 + $0x8] sm:$0xff] }
0x11a2   :  { %1516 = vrot.lane.b32.xlu1 %v1514_v29, %s2581_s2  ;;  %v1863_v29 = vld [vmem:[%s3126_s6 + $0x8] sm:$0xff] }
0x1212   :  { %v1624_v36 = vpop.permute.xlu0 %1623 }
0x1213   :  { %v1626_v37 = vadd.f32 %v1624_v36, %v1616_v34  ;;  %v1862_v34 = vld [vmem:[%s3126_s6] sm:$0xff]  ;;  %v1855_v36 = vsel %vm69_vm1, %v2903_v26, %v2854_v39 }
0x1214   :  { %v1517_v40 = vpop.permute.xlu1 %1516 }
0x1215   :  { %2509 = vtanh.f32 %v1626_v37  ;;  %v1519_v41 = vadd.f32 %v1517_v40, %v1509_v38  ;;  %v1825_v14 = vrot.slane %v1626_v37, 2 }
0x1217   :  { %2511 = vtanh.f32 %v1519_v41  ;;  %v1721_v0 = vrot.slane %v1519_v41, 6 }
0x1222   :  { %v2510_v42 = vpop.eup %2509 }
0x1223   :  { %1629 = vrot.lane.b32.xlu0 %v2510_v42, %s2581_s2 }
0x1224   :  { %v2512_v43 = vpop.eup %2511 }
0x1225   :  { %1522 = vrot.lane.b32.xlu1 %v2512_v43, %s2581_s2  ;;  %v1856_v43 = vsel %vm1845_vm4, %v1855_v36, %v2808_v48 }
0x1226   :  { %v1857_v26 = vsel %vm1847_vm5, %v1856_v43, %v2762_v60 }
0x1295   :  { %v1630_v44 = vpop.permute.xlu0 %1629 }
0x1296   :  { %v3040_v45 = vmul.f32 %v2506_v22, %v1630_v44  ;;  %v1860_v22 = vld [vmem:[%s3125_s5 + $0x10] sm:$0xff] }
0x1297   :  { %v1523_v47 = vpop.permute.xlu1 %1522 }
0x1298   :  { %v1741_v46 = vrot.slane %v3040_v45, 2  ;;  %v1525_v63 = vmul.f32 %v2508_v25, %v1523_v47  ;;  %v2102_v47 = vld [vmem:[%s3127_s7] ss:$0 sm:$0xff] }
0x129a   :  { %1742 = vrot.lane.b32.xlu0 %v1741_v46, %s2582_s15  ;;  %v1634_v50 = vrot.slane %v1525_v63, 4  ;;  %v3048_v51 = vsel %vm1845_vm4, %v1849_v49, %v1525_v63 }
0x129c   :  { %1635 = vrot.lane.b32.xlu1 %v1634_v50, %s2582_s15 }
0x130c   :  { %v1743_v52 = vpop.permute.xlu0 %1742 }
0x130d   :  { %2369 = vmatmul.mubr.msk.f32.vlgmr.msra.gmra.mxu0 %vm161_vm3, %v1743_v52 }
0x130e   :  { %v1636_v53 = vpop.permute.xlu1 %1635  ;;  %2383 = vmatpush3.msra.mxu0 %v1861_v20 }
0x130f   :  { %2358 = vmatmul.mubr.msk.f32.vlgmr.msra.gmra.mxu1 %vm161_vm3, %v1636_v53  ;;  %2384 = vmatprep.subr.mxu0 %v1860_v22 }
0x1310   :  { %2372 = vmatpush3.msra.mxu1 %v1865_v21  ;;  %2385 = vmatpush3.msra.mxu0 %v1860_v22 }
0x1311   :  { %2373 = vmatprep.subr.mxu1 %v1864_v24  ;;  %2386 = vmatprep.subr.mxu0 %v1859_v8 }
0x1312   :  { %2374 = vmatpush3.msra.mxu1 %v1864_v24  ;;  %2387 = vmatpush3.msra.mxu0 %v1859_v8 }
0x1313   :  { %2375 = vmatprep.subr.mxu1 %v1863_v29  ;;  %2388 = vmatprep.subr.mxu0 %v1858_v30 }
0x1314   :  { %2376 = vmatpush3.msra.mxu1 %v1863_v29  ;;  %2389 = vmatpush3.msra.mxu0 %v1858_v30 }
0x1315   :  { %2377 = vmatprep.subr.mxu1 %v1862_v34 }
0x1316   :  { %2378 = vmatpush3.msra.mxu1 %v1862_v34 }
0x13cd   :  { %v1812_v54 = vpop.f32.mrf.mxu0 }
0x13ce   :  { %v1816_v55 = vadd.f32 %v1812_v54, %v2740_v23 }
0x13cf   :  { %v2370_v56 = vpop.f32.mrf.mxu0  ;;  %v1705_v17 = vpop.f32.mrf.mxu1 }
0x13d0   :  { %2513 = vtanh.f32 %v1816_v55  ;;  %v1710_v58 = vrot.slane %v1705_v17, 2  ;;  %v2097_v1 = vmul.f32 -1.442695, %v1816_v55 }
0x13d1   :  { %v2359_v59 = vpop.f32.mrf.mxu1 }
0x13d2   :  { %v1712_v32 = vadd.f32 %v1710_v58, %v2742_v27 }
0x13d4   :  { %2515 = vtanh.f32 %v1712_v32  ;;  %v2095_v3 = vmul.f32 -1.442695, %v1712_v32 }
0x13d5   :  { %2517 = vpow2.f32 %v2097_v1 }
0x13d6   :  { %2519 = vpow2.f32 %v2095_v3 }
0x13dd   :  { %v2514_v61 = vpop.eup %2513 }
0x13de   :  { %1829 = vrot.lane.b32.xlu0 %v2514_v61, %s2581_s2 }
0x13e1   :  { %v2516_v62 = vpop.eup %2515 }
0x13e2   :  { %1725 = vrot.lane.b32.xlu1 %v2516_v62, %s2581_s2  ;;  %v2518_v9 = vpop.eup %2517 }
0x13e3   :  { %v1820_v23 = vadd.f32 1.0, %v2518_v9  ;;  %v2520_v11 = vpop.eup %2519 }
0x13e4   :  { %v1716_v13 = vadd.f32 1.0, %v2520_v11 }
0x13e5   :  { %2521 = vrcp.f32 %v1820_v23 }
0x13e6   :  { %2523 = vrcp.f32 %v1716_v13 }
0x13f2   :  { %v2522_v31 = vpop.eup %2521 }
0x13f3   :  { %v2524_v6 = vpop.eup %2523  ;;  %v1827_v16 = vmul.f32 %v2522_v31, %v1825_v14 }
0x13f4   :  { %v1723_v10 = vmul.f32 %v2524_v6, %v1721_v0 }
0x1450   :  { %v1830_v4 = vpop.permute.xlu0 %1829 }
0x1451   :  { %v1832_v27 = vmul.f32 %v2522_v31, %v1830_v4 }
0x1453   :  { %1834 = vrot.lane.b32.xlu0 %v1832_v27, %s2581_s2 }
0x1454   :  { %v1726_v7 = vpop.permute.xlu1 %1725 }
0x1455   :  { %v1728_v15 = vmul.f32 %v2524_v6, %v1726_v7 }
0x1457   :  { %1730 = vrot.lane.b32.xlu1 %v1728_v15, %s2581_s2 }
0x14c5   :  { %v1835_v18 = vpop.permute.xlu0 %1834 }
0x14c6   :  { %v1837_v19 = vadd.f32 %v1835_v18, %v1827_v16 }
0x14c8   :  { %2525 = vtanh.f32 %v1837_v19 }
0x14c9   :  { %v1731_v2 = vpop.permute.xlu1 %1730 }
0x14ca   :  { %v1733_v5 = vadd.f32 %v1731_v2, %v1723_v10 }
0x14cc   :  { %2527 = vtanh.f32 %v1733_v5 }
0x14d5   :  { %v2526_v25 = vpop.eup %2525 }
0x14d6   :  { %1840 = vrot.lane.b32.xlu0 %v2526_v25, %s2581_s2 }
0x14d9   :  { %v2528_v28 = vpop.eup %2527 }
0x14da   :  { %1736 = vrot.lane.b32.xlu1 %v2528_v28, %s2581_s2  ;;  %s2052_s2 = sshll.u32 %s2583_s14, 4  ;;  %s2053_s2 = int_to_ptr.vmem [resolvable:$true] %s2052_s2 }
0x14db   :  { %p2557_p6 = scmp.lt.s32.totalorder %s2053_s2, %s2053_s2 }
0x14de   :  { %1953 = vrot.lane.b32.xlu1 %v2909_v33, %s2582_s15 }
0x1548   :  { %v1841_v35 = vpop.permute.xlu0 %1840 }
0x1549   :  { %v1843_v33 = vmul.f32 %v2522_v31, %v1841_v35 }
0x154b   :  { %v1852_v37 = vsel %vm69_vm1, %v1843_v33, %v3040_v45 }
0x154c   :  { %v1853_v38 = vsel %vm1845_vm4, %v1852_v37, %v2996_v57  ;;  %v1737_v40 = vpop.permute.xlu1 %1736 }
0x154d   :  { %v1854_v41 = vsel %vm1847_vm5, %v1853_v38, %v2950_v12  ;;  %v1739_v42 = vmul.f32 %v2524_v6, %v1737_v40 }
0x154e   :  { %1868 = vrot.lane.b32.xlu0 %v1854_v41, %s2582_s15 }
0x154f   :  { %v1851_v44 = vsel %vm1847_vm5, %v3048_v51, %v1739_v42 }
0x1550   :  { %1955 = vrot.lane.b32.xlu1 %v1851_v44, %s2582_s15  ;;  %v1954_v39 = vpop.permute.xlu1 %1953 }
0x1551   :  { %2390 = vmatprep.mubr.msk.f32.mxu0 %vm161_vm3, %v1954_v39 }
0x1552   :  { %1870 = vrot.lane.b32.xlu0 %v1857_v26, %s2582_s15  ;;  %s2552_s15 = scalar_lea.vmem %s2053_s2, 256 }
0x1553   :  { %p2553_p5 = scmp.ne.s32.totalorder %s2053_s2, %s2552_s15  ;;  %p2558_p7 = scmp.lt.s32.totalorder %s2552_s15, %s2552_s15 }
0x1555   :  { %p2559_p8 = por %p2558_p7, %p2557_p6 }
0x1557   :  { %p2560_p9 = pnand %p2559_p8, %p2553_p5 }
0x15c0   :  { %v1869_v12 = vpop.permute.xlu0 %1868 }
0x15c1   :  { %2379 = vmatprep.mubr.msk.f32.mxu1 %vm161_vm3, %v1869_v12 }
0x15c2   :  { %v1956_v57 = vpop.permute.xlu1 %1955 }
0x15c3   :  { %2391 = vmatmul.mubr.msk.f32.vlgmr.msra.gmra.mxu0 %vm161_vm3, %v1956_v57 }
0x15c4   :  { %v1871_v48 = vpop.permute.xlu0 %1870 }
0x15c5   :  { %2380 = vmatmul.mubr.msk.f32.vlgmr.msra.gmra.mxu1 %vm161_vm3, %v1871_v48 }
0x1683   :  { %v2392_v45 = vpop.f32.mrf.mxu0 }
0x1685   :  { %v2381_v46 = vpop.f32.mrf.mxu1  ;;  %v2027_v63 = vpop.f32.mrf.mxu0 }
0x1686   :  { %v2033_v60 = vadd.f32 %v2392_v45, %v2381_v46 }
0x1687   :  { %v1942_v49 = vpop.f32.mrf.mxu1 }
0x1688   :  { %v2044_v50 = vadd.f32 %v2102_v47, %v2033_v60  ;;  %v2028_v51 = vadd.f32 %v2027_v63, %v1942_v49 }
0x168a   :  { %2046 = vst.msk [vmem:[#allocation5 + $0x8] sm:$0xff] %vm62_vm2, %v2044_v50  ;;  %v2043_v52 = vadd.f32 %v2102_v47, %v2028_v51 }
0x168c   :  { %2045 = vst.msk [vmem:[#allocation5] sm:$0xff] %vm62_vm2, %v2043_v52 }
0x168d   :  { %2563 = shalt.err (!%p2560_p9)
}
0x168e   :  { %2058 = dma.vmem_to_hbm [thread:$0]  %s2053_s2, 256, %s3128_s8, [#allocation4], %s2577_s30, %s2577_s30, %s2578_s9  }
0x168f   :  { %2574 = dma.done.wait [#allocation4], 256  }
0x1690   :  { %2575 = vsyncadd [#allocation4], 4294967040 }
0x1691   :  { %2062 = vsyncpa [#allocation3], 1 }
0x1692   :  { %2063 = vsyncpa [#allocation4], 1 }

</bundles_post_ra>
